<compile_context>
chip_gen: v7x
topology: tpu7x:2x2x1
jax: 0.10.0
libtpu: 0.0.40
codegen_flags: <defaults>
</compile_context>

<pallas_src>
import jax
import jax.numpy as jnp
from jax import lax
from jax.experimental import pallas as pl
from jax.experimental.pallas import tpu as pltpu

# ----- small demo configuration consistent with the module -----
BATCH = 2
SEQ = 16
HIDDEN = 32
NUM_HEADS = 8
HEAD_DIM = 8
STATE = 16
EXPAND = 2
N_GROUPS = 1
CONV_K = 4
CHUNK = 8            # chunk_size (256 in production; small here for the demo)
EPS = 1e-5

INTER = EXPAND * HIDDEN                      # 64 == NUM_HEADS * HEAD_DIM
GN = N_GROUPS * STATE
CONV_DIM = INTER + 2 * GN                    # 96
PROJ = INTER + CONV_DIM + NUM_HEADS          # 168  (d_mlp == 0)
HPG = NUM_HEADS // N_GROUPS

assert INTER == NUM_HEADS * HEAD_DIM
assert SEQ % CHUNK == 0                      # pad_size == 0 for the chosen shapes
assert CHUNK >= CONV_K - 1                   # conv left-context fits in one chunk
assert CONV_K - 1 <= 8                       # carry fits the 8-row aligned scratch


# ---------------------------------------------------------------------------
# helpers
# ---------------------------------------------------------------------------
def _softplus(x):
    # numerically stable softplus, matches torch.nn.functional.softplus
    return jnp.maximum(x, 0.0) + jnp.log1p(jnp.exp(-jnp.abs(x)))


def _mm(a, b, ca, cb):
    """2-D dot_general contracting dim `ca` of a with dim `cb` of b (f32 acc)."""
    return lax.dot_general(a, b, (((ca,), (cb,)), ((), ())),
                           preferred_element_type=jnp.float32)


def _cat(parts, axis):
    return parts[0] if len(parts) == 1 else jnp.concatenate(parts, axis=axis)


# ---------------------------------------------------------------------------
# fused kernel: one (batch, chunk) tile per grid step; chunk axis sequential
# (the carried scratch state relies on it — do NOT mark it "parallel")
# ---------------------------------------------------------------------------
def mamba2_fused_kernel(x_ref, in_w_ref, in_b_ref, conv_w_ref,
                        a_log_ref, dt_bias_ref, d_row_ref,
                        norm_w_ref, out_w_ref, out_b_ref,
                        o_ref,
                        conv_carry_ref, state_ref):
    c = pl.program_id(1)                                  # chunk index (sequential)

    @pl.when(c == 0)
    def _init():                                          # fresh sequence
        conv_carry_ref[...] = jnp.zeros_like(conv_carry_ref)
        state_ref[...] = jnp.zeros_like(state_ref)

    # ---- in_proj: bf16 operands, f32 accumulation ----
    x = x_ref[0, 0]                                       # (CHUNK, HIDDEN) f32
    proj = jnp.dot(x.astype(jnp.bfloat16), in_w_ref[...],
                   preferred_element_type=jnp.float32) + in_b_ref[...]
    gate = proj[:, :INTER]
    xbc = proj[:, INTER:INTER + CONV_DIM]
    dt_raw = proj[:, INTER + CONV_DIM:]                   # (CHUNK, H)

    # ---- causal depthwise conv1d + SiLU (8-row aligned left-context carry) ----
    carry = conv_carry_ref[...]                           # (8, CONV_DIM), aligned read
    xfull = jnp.concatenate([carry, xbc], axis=0)         # boundary at sublane 8
    base = 8 - (CONV_K - 1)
    acc = xbc * conv_w_ref[CONV_K - 1:CONV_K, :]          # aligned tap is xbc itself
    for k in range(CONV_K - 1):
        acc = acc + xfull[base + k:base + k + CHUNK, :] * conv_w_ref[k:k + 1, :]
    xbc_act = acc * jax.nn.sigmoid(acc)                   # use_conv_bias=False, SiLU
    # stash last K-1 (pre-activation) rows as left context for the next chunk
    conv_carry_ref[base:, :] = xbc[CHUNK - (CONV_K - 1):, :]

    hs = xbc_act[:, :INTER]                               # (CHUNK, INTER)
    b_grp = xbc_act[:, INTER:INTER + GN]                  # (CHUNK, G*N)
    c_grp = xbc_act[:, INTER + GN:]                       # (CHUNK, G*N)

    # ---- dt / cumulative decays, all heads at once ----
    dt = _softplus(dt_raw + dt_bias_ref[...])             # (CHUNK, H)
    # time_step_limit == (0, inf) -> clamp is a no-op
    a_dt = dt * (-jnp.exp(a_log_ref[...]))                # (CHUNK, H), <= 0

    row = lax.broadcasted_iota(jnp.int32, (CHUNK, CHUNK), 0)
    col = lax.broadcasted_iota(jnp.int32, (CHUNK, CHUNK), 1)
    incl = row >= col                                     # bool, the only big mask
    tril_f = incl.astype(jnp.float32)

    a_cum = _mm(tril_f, a_dt, 1, 0)                       # (CHUNK, H) incl. cumsum
    a_cum_t = _mm(a_dt, tril_f, 0, 1)                     # (H, CHUNK) == a_cum^T
    a_tot = a_cum[CHUNK - 1:CHUNK, :]                     # (1, H) total chunk decay
    decay_states = jnp.exp(a_tot - a_cum)                 # (CHUNK, H), <= 1
    exp_a_cum = jnp.exp(a_cum)                            # (CHUNK, H), <= 1
    decay_chunk = jnp.exp(a_tot)                          # (1, H)

    # head -> channel expansion (repeat each head column HEAD_DIM times) via a
    # tiny 0/1 matmul — no in-kernel reshape/transpose/integer-division.
    hh_i = lax.broadcasted_iota(jnp.int32, (NUM_HEADS, INTER), 0)
    cc_i = lax.broadcasted_iota(jnp.int32, (NUM_HEADS, INTER), 1)
    expand_m = ((cc_i >= hh_i * HEAD_DIM) &
                (cc_i < (hh_i + 1) * HEAD_DIM)).astype(jnp.float32)   # (H, INTER)

    dt_exp = _mm(dt, expand_m, 1, 0)                      # (CHUNK, INTER)
    decay_exp = _mm(decay_states, expand_m, 1, 0)         # (CHUNK, INTER)
    exp_a_cum_exp = _mm(exp_a_cum, expand_m, 1, 0)        # (CHUNK, INTER)
    decay_chunk_col = _mm(expand_m, decay_chunk, 0, 1)    # (INTER, 1)

    x_dt = hs * dt_exp                                    # (CHUNK, INTER)
    x_dt_decay = x_dt * decay_exp                         # (CHUNK, INTER)

    y_diag_parts = []
    y_off_parts = []
    for g in range(N_GROUPS):
        gs = g * HPG * HEAD_DIM
        ge = gs + HPG * HEAD_DIM
        b_g = b_grp[:, g * STATE:(g + 1) * STATE]         # (L, N)
        c_g = c_grp[:, g * STATE:(g + 1) * STATE]         # (L, N)
        g_mat = _mm(c_g, b_g, 1, 1)                       # C @ B^T  (L, L), per group

        st_g = state_ref[gs:ge, :]                        # state entering the chunk
        # inter-chunk term: one (L,N)@(N, HPG*P) matmul per group
        y_off_g = _mm(c_g, st_g, 1, 1) * exp_a_cum_exp[:, gs:ge]      # (L, HPG*P)
        # chunk state + carried-state update: one matmul + one FMA per group
        cst_g = _mm(x_dt_decay[:, gs:ge], b_g, 0, 0)                  # (HPG*P, N)
        state_ref[gs:ge, :] = decay_chunk_col[gs:ge, :] * st_g + cst_g

        # intra-chunk term stays per head (masked exp keeps it overflow-free)
        # TODO(synk): lax.fori_loop(..., unroll=4) at production head counts
        for hl in range(HPG):
            h = g * HPG + hl
            cs = h * HEAD_DIM
            diff = a_cum[:, h:h + 1] - a_cum_t[h:h + 1, :]            # (L, L)
            l_mat = jnp.where(incl, jnp.exp(jnp.minimum(diff, 0.0)), 0.0)
            y_diag_parts.append(
                _mm(g_mat * l_mat, x_dt[:, cs:cs + HEAD_DIM], 1, 0))  # (L, P)
        y_off_parts.append(y_off_g)

    # assemble once: lane-dense (CHUNK, INTER) value, no per-head stores
    y = _cat(y_diag_parts, 1) + _cat(y_off_parts, 1) + hs * d_row_ref[...]

    # ---- RMSNormGated(norm_before_gate=False) + out_proj (bf16 operands) ----
    xg = y * (gate * jax.nn.sigmoid(gate))
    var = jnp.mean(xg * xg, axis=-1, keepdims=True)
    xn = xg * lax.rsqrt(var + EPS) * norm_w_ref[...]
    out = jnp.dot(xn.astype(jnp.bfloat16), out_w_ref[...],
                  preferred_element_type=jnp.float32) + out_b_ref[...]
    o_ref[0, 0] = out                                     # single lane-dense write


# ---------------------------------------------------------------------------
# wrapper
# ---------------------------------------------------------------------------
def mamba2_forward(x, params):
    b, s, _ = x.shape
    nc = s // CHUNK
    # free (contiguous) reshape so block last-two-dims equal full array dims
    x4 = x.reshape(b, nc, CHUNK, HIDDEN)

    d_row = jnp.repeat(params["D"], HEAD_DIM).reshape(1, INTER)
    in_w_bf = params["in_w"].astype(jnp.bfloat16)
    out_w_bf = params["out_w"].astype(jnp.bfloat16)

    out4 = pl.pallas_call(
        mamba2_fused_kernel,
        out_shape=jax.ShapeDtypeStruct((b, nc, CHUNK, HIDDEN), jnp.float32),
        grid=(b, nc),
        in_specs=[
            pl.BlockSpec((1, 1, CHUNK, HIDDEN), lambda i, c: (i, c, 0, 0)),
            pl.BlockSpec((HIDDEN, PROJ), lambda i, c: (0, 0)),       # in_w (bf16)
            pl.BlockSpec((1, PROJ), lambda i, c: (0, 0)),            # in_b
            pl.BlockSpec((CONV_K, CONV_DIM), lambda i, c: (0, 0)),   # conv_w
            pl.BlockSpec((1, NUM_HEADS), lambda i, c: (0, 0)),       # A_log
            pl.BlockSpec((1, NUM_HEADS), lambda i, c: (0, 0)),       # dt_bias
            pl.BlockSpec((1, INTER), lambda i, c: (0, 0)),           # D per channel
            pl.BlockSpec((1, INTER), lambda i, c: (0, 0)),           # norm weight
            pl.BlockSpec((INTER, HIDDEN), lambda i, c: (0, 0)),      # out_w (bf16)
            pl.BlockSpec((1, HIDDEN), lambda i, c: (0, 0)),          # out_b
        ],
        out_specs=pl.BlockSpec((1, 1, CHUNK, HIDDEN), lambda i, c: (i, c, 0, 0)),
        scratch_shapes=[
            pltpu.VMEM((8, CONV_DIM), jnp.float32),    # conv left-context carry
            pltpu.VMEM((INTER, STATE), jnp.float32),   # carried SSM state
            # (STATE=128 in production makes the state scratch lane-dense)
        ],
        compiler_params=pltpu.CompilerParams(
            dimension_semantics=("parallel", "arbitrary")),
    )(x4,
      in_w_bf, params["in_b"].reshape(1, PROJ), params["conv_w"],
      params["A_log"].reshape(1, NUM_HEADS),
      params["dt_bias"].reshape(1, NUM_HEADS),
      d_row,
      params["norm_w"].reshape(1, INTER),
      out_w_bf, params["out_b"].reshape(1, HIDDEN))

    return out4.reshape(b, s, HIDDEN)


# ---------------------------------------------------------------------------
# pure-JAX reference (same prefill math, same bf16 projections) for the check
# ---------------------------------------------------------------------------
def mamba2_reference(x, params):
    b, s, _ = x.shape
    nc = s // CHUNK
    in_w_bf = params["in_w"].astype(jnp.bfloat16)
    out_w_bf = params["out_w"].astype(jnp.bfloat16)

    proj = jnp.dot(x.astype(jnp.bfloat16), in_w_bf,
                   preferred_element_type=jnp.float32) + params["in_b"]
    gate = proj[..., :INTER]
    xbc = proj[..., INTER:INTER + CONV_DIM]
    dt_raw = proj[..., INTER + CONV_DIM:]

    xpad = jnp.pad(xbc, ((0, 0), (CONV_K - 1, 0), (0, 0)))
    conv = sum(xpad[:, k:k + s, :] * params["conv_w"][k] for k in range(CONV_K))
    xbc_act = conv * jax.nn.sigmoid(conv)

    hs = xbc_act[..., :INTER].reshape(b, s, NUM_HEADS, HEAD_DIM)
    B = jnp.repeat(xbc_act[..., INTER:INTER + GN].reshape(b, s, N_GROUPS, STATE),
                   HPG, axis=2)
    C = jnp.repeat(xbc_act[..., INTER + GN:].reshape(b, s, N_GROUPS, STATE),
                   HPG, axis=2)

    dt = _softplus(dt_raw + params["dt_bias"])
    a_dt = dt * (-jnp.exp(params["A_log"]))
    x_dt = hs * dt[..., None]
    d_res = params["D"][None, None, :, None] * hs

    ck = lambda t: t.reshape(b, nc, CHUNK, *t.shape[2:])
    x_dt_c, a_dt_c, B_c, C_c = map(ck, (x_dt, a_dt, B, C))

    a_cum = jnp.cumsum(a_dt_c, axis=2)
    a_tot = a_cum[:, :, -1:, :]
    decay_states = jnp.exp(a_tot - a_cum)
    exp_a_cum = jnp.exp(a_cum)

    idx = jnp.arange(CHUNK)
    mask = idx[:, None] >= idx[None, :]
    seg = a_cum[:, :, :, None, :] - a_cum[:, :, None, :, :]
    l_mat = jnp.where(mask[None, None, :, :, None], jnp.exp(seg), 0.0)
    g_mat = jnp.einsum('bclhn,bckhn->bclkh', C_c, B_c)
    y_diag = jnp.einsum('bclkh,bckhp->bclhp', g_mat * l_mat, x_dt_c)

    chunk_states = jnp.einsum('bclhp,bclhn->bchpn',
                              x_dt_c, B_c * decay_states[..., None])
    dA = jnp.exp(a_tot[:, :, 0, :])

    def step(state, inp):
        cst, d = inp
        return d[..., None, None] * state + cst, state
    init = jnp.zeros((b, NUM_HEADS, HEAD_DIM, STATE), jnp.float32)
    _, states_in = lax.scan(step, init,
                            (chunk_states.transpose(1, 0, 2, 3, 4),
                             dA.transpose(1, 0, 2)))
    states_in = states_in.transpose(1, 0, 2, 3, 4)

    y_off = jnp.einsum('bclhn,bchpn->bclhp', C_c, states_in) * exp_a_cum[..., None]
    y = (y_diag + y_off).reshape(b, s, NUM_HEADS, HEAD_DIM) + d_res
    y = y.reshape(b, s, INTER)

    xg = y * (gate * jax.nn.sigmoid(gate))
    var = jnp.mean(xg * xg, axis=-1, keepdims=True)
    xn = xg * lax.rsqrt(var + EPS) * params["norm_w"]
    out = jnp.dot(xn.astype(jnp.bfloat16), out_w_bf,
                  preferred_element_type=jnp.float32) + params["out_b"]
    return out


# ---------------------------------------------------------------------------
# deterministic parameter init (shapes from Mamba2.__init__)
# ---------------------------------------------------------------------------
def init_params(key):
    ks = jax.random.split(key, 5)
    return {
        # nn.Linear(hidden, proj, bias=True): weight (proj, hidden) -> stored W^T
        "in_w": jax.random.normal(ks[0], (HIDDEN, PROJ), jnp.float32) * 0.3,
        "in_b": jax.random.normal(ks[1], (PROJ,), jnp.float32) * 0.1,
        # nn.Conv1d(conv_dim, conv_dim, K, groups=conv_dim): weight (conv_dim,1,K)
        # stored as (K, conv_dim) == weight.squeeze(1).T
        "conv_w": jax.random.normal(ks[2], (CONV_K, CONV_DIM), jnp.float32) * 0.3,
        "dt_bias": jnp.ones((NUM_HEADS,), jnp.float32),
        "A_log": jnp.log(jnp.arange(1, NUM_HEADS + 1, dtype=jnp.float32)),
        "D": jnp.ones((NUM_HEADS,), jnp.float32),
        "norm_w": jnp.ones((INTER,), jnp.float32),
        # nn.Linear(inter, hidden, bias=True): weight (hidden, inter) -> stored W^T
        "out_w": jax.random.normal(ks[3], (INTER, HIDDEN), jnp.float32) * 0.2,
        "out_b": jax.random.normal(ks[4], (HIDDEN,), jnp.float32) * 0.1,
    }


if __name__ == "__main__":
    key = jax.random.PRNGKey(0)
    pkey, xkey = jax.random.split(key)
    params = init_params(pkey)
    x = jax.random.normal(xkey, (BATCH, SEQ, HIDDEN), jnp.float32)

    out = jax.jit(mamba2_forward)(x, params)
    jax.block_until_ready(out)
    assert out.shape == (BATCH, SEQ, HIDDEN)
    assert bool(jnp.all(jnp.isfinite(out)))

    ref = mamba2_reference(x, params)
    max_err = float(jnp.max(jnp.abs(out - ref)))
    assert bool(jnp.allclose(out, ref, rtol=1e-2, atol=1e-3)), max_err

    print("KERNEL_OK")
</pallas_src>

<mosaic_0001>
module attributes {stable_mosaic.version = 11 : i64} {
  func.func @mamba2_fused_kernel(%arg0: i32, %arg1: i32, %arg2: memref<1x1x8x32xf32, #tpu.memory_space<vmem>>, %arg3: memref<32x168xbf16, #tpu.memory_space<vmem>>, %arg4: memref<1x168xf32, #tpu.memory_space<vmem>>, %arg5: memref<4x96xf32, #tpu.memory_space<vmem>>, %arg6: memref<1x8xf32, #tpu.memory_space<vmem>>, %arg7: memref<1x8xf32, #tpu.memory_space<vmem>>, %arg8: memref<1x64xf32, #tpu.memory_space<vmem>>, %arg9: memref<1x64xf32, #tpu.memory_space<vmem>>, %arg10: memref<64x32xbf16, #tpu.memory_space<vmem>>, %arg11: memref<1x32xf32, #tpu.memory_space<vmem>>, %arg12: memref<1x1x8x32xf32, #tpu.memory_space<vmem>>, %arg13: memref<8x96xf32, #tpu.memory_space<vmem>>, %arg14: memref<64x16xf32, #tpu.memory_space<vmem>>) attributes {dimension_semantics = [#tpu.dimension_semantics<parallel>, #tpu.dimension_semantics<arbitrary>], iteration_bounds = array<i64: 2, 2>, scalar_prefetch = 0 : i64, scratch_operands = 2 : i64, tpu.core_type = #tpu.core_type<tc>, window_params = [{transform_indices = @transform_0, window_bounds = array<i64: 1, 1, 8, 32>}, {pipeline_mode = #tpu.pipeline_mode<synchronous>, transform_indices = @transform_1, window_bounds = array<i64: 32, 168>}, {pipeline_mode = #tpu.pipeline_mode<synchronous>, transform_indices = @transform_2, window_bounds = array<i64: 1, 168>}, {pipeline_mode = #tpu.pipeline_mode<synchronous>, transform_indices = @transform_3, window_bounds = array<i64: 4, 96>}, {pipeline_mode = #tpu.pipeline_mode<synchronous>, transform_indices = @transform_4, window_bounds = array<i64: 1, 8>}, {pipeline_mode = #tpu.pipeline_mode<synchronous>, transform_indices = @transform_5, window_bounds = array<i64: 1, 8>}, {pipeline_mode = #tpu.pipeline_mode<synchronous>, transform_indices = @transform_6, window_bounds = array<i64: 1, 64>}, {pipeline_mode = #tpu.pipeline_mode<synchronous>, transform_indices = @transform_7, window_bounds = array<i64: 1, 64>}, {pipeline_mode = #tpu.pipeline_mode<synchronous>, transform_indices = @transform_8, window_bounds = array<i64: 64, 32>}, {pipeline_mode = #tpu.pipeline_mode<synchronous>, transform_indices = @transform_9, window_bounds = array<i64: 1, 32>}, {transform_indices = @transform_10, window_bounds = array<i64: 1, 1, 8, 32>}]} {
    %c0_i32 = arith.constant 0 : i32
    %0 = arith.cmpi eq, %arg1, %c0_i32 : i32
    %1 = arith.extui %0 : i1 to i32
    %c0_i32_0 = arith.constant 0 : i32
    %2 = arith.cmpi ne, %1, %c0_i32_0 : i32
    scf.if %2 {
      %cst_79 = arith.constant 0.000000e+00 : f32
      %242 = vector.broadcast %cst_79 : f32 to vector<8x96xf32>
      %c0_80 = arith.constant 0 : index
      %c0_81 = arith.constant 0 : index
      %243 = vector.load %arg13[%c0_80, %c0_81] : memref<8x96xf32, #tpu.memory_space<vmem>>, vector<8x96xf32>
      tpu.vector_store %arg13[%c0_80, %c0_81], %242 {strides = array<i32>} : memref<8x96xf32, #tpu.memory_space<vmem>>, vector<8x96xf32>,
      %cst_82 = arith.constant 0.000000e+00 : f32
      %244 = vector.broadcast %cst_82 : f32 to vector<64x16xf32>
      %c0_83 = arith.constant 0 : index
      %c0_84 = arith.constant 0 : index
      %245 = vector.load %arg14[%c0_83, %c0_84] : memref<64x16xf32, #tpu.memory_space<vmem>>, vector<64x16xf32>
      tpu.vector_store %arg14[%c0_83, %c0_84], %244 {strides = array<i32>} : memref<64x16xf32, #tpu.memory_space<vmem>>, vector<64x16xf32>,
    } else {
    }
    %c0 = arith.constant 0 : index
    %c0_1 = arith.constant 0 : index
    %c0_2 = arith.constant 0 : index
    %c0_3 = arith.constant 0 : index
    %3 = vector.load %arg2[%c0, %c0_1, %c0_2, %c0_3] : memref<1x1x8x32xf32, #tpu.memory_space<vmem>>, vector<1x1x8x32xf32>
    %4 = vector.shape_cast %3 : vector<1x1x8x32xf32> to vector<8x32xf32>
    %5 = arith.truncf %4 : vector<8x32xf32> to vector<8x32xbf16>
    %c0_4 = arith.constant 0 : index
    %c0_5 = arith.constant 0 : index
    %6 = vector.load %arg3[%c0_4, %c0_5] : memref<32x168xbf16, #tpu.memory_space<vmem>>, vector<32x168xbf16>
    %cst = arith.constant dense<0.000000e+00> : vector<8x168xf32>
    %7 = tpu.matmul %5, %6, %cst {dimension_numbers = #tpu.dot_dimension_numbers<[1], [0], [0], [1], [0, 0, 1, 1], [], []>} : vector<8x32xbf16>, vector<32x168xbf16>, vector<8x168xf32> -> vector<8x168xf32>
    %c0_6 = arith.constant 0 : index
    %c0_7 = arith.constant 0 : index
    %8 = vector.load %arg4[%c0_6, %c0_7] : memref<1x168xf32, #tpu.memory_space<vmem>>, vector<1x168xf32>
    %9 = vector.broadcast %8 : vector<1x168xf32> to vector<8x168xf32>
    %10 = arith.addf %7, %9 : vector<8x168xf32>
    %11 = vector.extract_strided_slice %10 {offsets = [0, 0], sizes = [8, 64], strides = [1, 1]} : vector<8x168xf32> to vector<8x64xf32>
    %12 = vector.extract_strided_slice %10 {offsets = [0, 64], sizes = [8, 96], strides = [1, 1]} : vector<8x168xf32> to vector<8x96xf32>
    %13 = vector.extract_strided_slice %10 {offsets = [0, 160], sizes = [8, 8], strides = [1, 1]} : vector<8x168xf32> to vector<8x8xf32>
    %c0_8 = arith.constant 0 : index
    %c0_9 = arith.constant 0 : index
    %14 = vector.load %arg13[%c0_8, %c0_9] : memref<8x96xf32, #tpu.memory_space<vmem>>, vector<8x96xf32>
    %15 = tpu.concatenate %14, %12 in 0 : vector<8x96xf32>, vector<8x96xf32> -> vector<16x96xf32>
    %c3 = arith.constant 3 : index
    %c0_10 = arith.constant 0 : index
    %16 = vector.load %arg5[%c3, %c0_10] : memref<4x96xf32, #tpu.memory_space<vmem>>, vector<1x96xf32>
    %17 = vector.broadcast %16 : vector<1x96xf32> to vector<8x96xf32>
    %18 = arith.mulf %12, %17 : vector<8x96xf32>
    %19 = vector.extract_strided_slice %15 {offsets = [5, 0], sizes = [8, 96], strides = [1, 1]} : vector<16x96xf32> to vector<8x96xf32>
    %c0_11 = arith.constant 0 : index
    %c0_12 = arith.constant 0 : index
    %20 = vector.load %arg5[%c0_11, %c0_12] : memref<4x96xf32, #tpu.memory_space<vmem>>, vector<1x96xf32>
    %21 = vector.broadcast %20 : vector<1x96xf32> to vector<8x96xf32>
    %22 = arith.mulf %19, %21 : vector<8x96xf32>
    %23 = arith.addf %18, %22 : vector<8x96xf32>
    %24 = vector.extract_strided_slice %15 {offsets = [6, 0], sizes = [8, 96], strides = [1, 1]} : vector<16x96xf32> to vector<8x96xf32>
    %c1 = arith.constant 1 : index
    %c0_13 = arith.constant 0 : index
    %25 = vector.load %arg5[%c1, %c0_13] : memref<4x96xf32, #tpu.memory_space<vmem>>, vector<1x96xf32>
    %26 = vector.broadcast %25 : vector<1x96xf32> to vector<8x96xf32>
    %27 = arith.mulf %24, %26 : vector<8x96xf32>
    %28 = arith.addf %23, %27 : vector<8x96xf32>
    %29 = vector.extract_strided_slice %15 {offsets = [7, 0], sizes = [8, 96], strides = [1, 1]} : vector<16x96xf32> to vector<8x96xf32>
    %c2 = arith.constant 2 : index
    %c0_14 = arith.constant 0 : index
    %30 = vector.load %arg5[%c2, %c0_14] : memref<4x96xf32, #tpu.memory_space<vmem>>, vector<1x96xf32>
    %31 = vector.broadcast %30 : vector<1x96xf32> to vector<8x96xf32>
    %32 = arith.mulf %29, %31 : vector<8x96xf32>
    %33 = arith.addf %28, %32 : vector<8x96xf32>
    %34 = arith.negf %33 : vector<8x96xf32>
    %35 = math.exp %34 : vector<8x96xf32>
    %cst_15 = arith.constant 1.000000e+00 : f32
    %36 = vector.broadcast %cst_15 : f32 to vector<8x96xf32>
    %37 = arith.addf %36, %35 : vector<8x96xf32>
    %38 = arith.divf %36, %37 : vector<8x96xf32>
    %39 = arith.mulf %33, %38 : vector<8x96xf32>
    %40 = vector.extract_strided_slice %12 {offsets = [5, 0], sizes = [3, 96], strides = [1, 1]} : vector<8x96xf32> to vector<3x96xf32>
    %c5 = arith.constant 5 : index
    %c0_16 = arith.constant 0 : index
    %41 = vector.load %arg13[%c5, %c0_16] : memref<8x96xf32, #tpu.memory_space<vmem>>, vector<3x96xf32>
    tpu.vector_store %arg13[%c5, %c0_16], %40 {strides = array<i32>} : memref<8x96xf32, #tpu.memory_space<vmem>>, vector<3x96xf32>,
    %42 = vector.extract_strided_slice %39 {offsets = [0, 0], sizes = [8, 64], strides = [1, 1]} : vector<8x96xf32> to vector<8x64xf32>
    %43 = vector.extract_strided_slice %39 {offsets = [0, 64], sizes = [8, 16], strides = [1, 1]} : vector<8x96xf32> to vector<8x16xf32>
    %44 = vector.extract_strided_slice %39 {offsets = [0, 80], sizes = [8, 16], strides = [1, 1]} : vector<8x96xf32> to vector<8x16xf32>
    %c0_17 = arith.constant 0 : index
    %c0_18 = arith.constant 0 : index
    %45 = vector.load %arg7[%c0_17, %c0_18] : memref<1x8xf32, #tpu.memory_space<vmem>>, vector<1x8xf32>
    %46 = vector.broadcast %45 : vector<1x8xf32> to vector<8x8xf32>
    %47 = arith.addf %13, %46 : vector<8x8xf32>
    %cst_19 = arith.constant 0.000000e+00 : f32
    %48 = vector.broadcast %cst_19 : f32 to vector<8x8xf32>
    %49 = arith.maximumf %47, %48 : vector<8x8xf32>
    %50 = math.absf %47 : vector<8x8xf32>
    %cst_20 = arith.constant 0.000000e+00 : f32
    %51 = vector.broadcast %cst_20 : f32 to vector<8x8xf32>
    %52 = arith.subf %51, %50 : vector<8x8xf32>
    %53 = math.exp %52 : vector<8x8xf32>
    %54 = math.log1p %53 : vector<8x8xf32>
    %55 = arith.addf %49, %54 : vector<8x8xf32>
    %c0_21 = arith.constant 0 : index
    %c0_22 = arith.constant 0 : index
    %56 = vector.load %arg6[%c0_21, %c0_22] : memref<1x8xf32, #tpu.memory_space<vmem>>, vector<1x8xf32>
    %57 = math.exp %56 : vector<1x8xf32>
    %cst_23 = arith.constant 0.000000e+00 : f32
    %58 = vector.broadcast %cst_23 : f32 to vector<1x8xf32>
    %59 = arith.subf %58, %57 : vector<1x8xf32>
    %60 = vector.broadcast %59 : vector<1x8xf32> to vector<8x8xf32>
    %61 = arith.mulf %55, %60 : vector<8x8xf32>
    %62 = tpu.iota {dimensions = array<i32: 0>} : vector<8x8xi32>
    %63 = tpu.iota {dimensions = array<i32: 1>} : vector<8x8xi32>
    %64 = arith.cmpi sge, %62, %63 : vector<8x8xi32>
    %65 = arith.extui %64 : vector<8x8xi1> to vector<8x8xi32>
    %66 = arith.sitofp %65 : vector<8x8xi32> to vector<8x8xf32>
    %cst_24 = arith.constant dense<0.000000e+00> : vector<8x8xf32>
    %67 = tpu.matmul %66, %61, %cst_24 {dimension_numbers = #tpu.dot_dimension_numbers<[1], [0], [0], [1], [0, 0, 1, 1], [], []>} : vector<8x8xf32>, vector<8x8xf32>, vector<8x8xf32> -> vector<8x8xf32>
    %cst_25 = arith.constant dense<0.000000e+00> : vector<8x8xf32>
    %68 = tpu.matmul %61, %66, %cst_25 {dimension_numbers = #tpu.dot_dimension_numbers<[0], [1], [1], [0], [0, 1, 1, 0], [], []>} : vector<8x8xf32>, vector<8x8xf32>, vector<8x8xf32> -> vector<8x8xf32>
    %69 = vector.extract_strided_slice %67 {offsets = [7, 0], sizes = [1, 8], strides = [1, 1]} : vector<8x8xf32> to vector<1x8xf32>
    %70 = vector.broadcast %69 : vector<1x8xf32> to vector<8x8xf32>
    %71 = arith.subf %70, %67 : vector<8x8xf32>
    %72 = math.exp %71 : vector<8x8xf32>
    %73 = math.exp %67 : vector<8x8xf32>
    %74 = math.exp %69 : vector<1x8xf32>
    %75 = tpu.iota {dimensions = array<i32: 0>} : vector<8x64xi32>
    %76 = tpu.iota {dimensions = array<i32: 1>} : vector<8x64xi32>
    %c8_i32 = arith.constant 8 : i32
    %77 = vector.broadcast %c8_i32 : i32 to vector<8x64xi32>
    %78 = arith.muli %75, %77 : vector<8x64xi32>
    %79 = arith.cmpi sge, %76, %78 : vector<8x64xi32>
    %c1_i32 = arith.constant 1 : i32
    %80 = vector.broadcast %c1_i32 : i32 to vector<8x64xi32>
    %81 = arith.addi %75, %80 : vector<8x64xi32>
    %c8_i32_26 = arith.constant 8 : i32
    %82 = vector.broadcast %c8_i32_26 : i32 to vector<8x64xi32>
    %83 = arith.muli %81, %82 : vector<8x64xi32>
    %84 = arith.cmpi slt, %76, %83 : vector<8x64xi32>
    %85 = arith.andi %79, %84 : vector<8x64xi1>
    %86 = arith.extui %85 : vector<8x64xi1> to vector<8x64xi32>
    %87 = arith.sitofp %86 : vector<8x64xi32> to vector<8x64xf32>
    %cst_27 = arith.constant dense<0.000000e+00> : vector<8x64xf32>
    %88 = tpu.matmul %55, %87, %cst_27 {dimension_numbers = #tpu.dot_dimension_numbers<[1], [0], [0], [1], [0, 0, 1, 1], [], []>} : vector<8x8xf32>, vector<8x64xf32>, vector<8x64xf32> -> vector<8x64xf32>
    %cst_28 = arith.constant dense<0.000000e+00> : vector<8x64xf32>
    %89 = tpu.matmul %72, %87, %cst_28 {dimension_numbers = #tpu.dot_dimension_numbers<[1], [0], [0], [1], [0, 0, 1, 1], [], []>} : vector<8x8xf32>, vector<8x64xf32>, vector<8x64xf32> -> vector<8x64xf32>
    %cst_29 = arith.constant dense<0.000000e+00> : vector<8x64xf32>
    %90 = tpu.matmul %73, %87, %cst_29 {dimension_numbers = #tpu.dot_dimension_numbers<[1], [0], [0], [1], [0, 0, 1, 1], [], []>} : vector<8x8xf32>, vector<8x64xf32>, vector<8x64xf32> -> vector<8x64xf32>
    %cst_30 = arith.constant dense<0.000000e+00> : vector<64x1xf32>
    %91 = tpu.matmul %87, %74, %cst_30 {dimension_numbers = #tpu.dot_dimension_numbers<[0], [1], [1], [0], [0, 1, 1, 0], [], []>} : vector<8x64xf32>, vector<1x8xf32>, vector<64x1xf32> -> vector<64x1xf32>
    %92 = arith.mulf %42, %88 : vector<8x64xf32>
    %93 = arith.mulf %92, %89 : vector<8x64xf32>
    %cst_31 = arith.constant dense<0.000000e+00> : vector<8x8xf32>
    %94 = tpu.matmul %44, %43, %cst_31 {dimension_numbers = #tpu.dot_dimension_numbers<[1], [1], [0], [0], [0, 0, 1, 0], [], []>} : vector<8x16xf32>, vector<8x16xf32>, vector<8x8xf32> -> vector<8x8xf32>
    %c0_32 = arith.constant 0 : index
    %c0_33 = arith.constant 0 : index
    %95 = vector.load %arg14[%c0_32, %c0_33] : memref<64x16xf32, #tpu.memory_space<vmem>>, vector<64x16xf32>
    %cst_34 = arith.constant dense<0.000000e+00> : vector<8x64xf32>
    %96 = tpu.matmul %44, %95, %cst_34 {dimension_numbers = #tpu.dot_dimension_numbers<[1], [1], [0], [0], [0, 0, 1, 0], [], []>} : vector<8x16xf32>, vector<64x16xf32>, vector<8x64xf32> -> vector<8x64xf32>
    %97 = arith.mulf %96, %90 : vector<8x64xf32>
    %cst_35 = arith.constant dense<0.000000e+00> : vector<64x16xf32>
    %98 = tpu.matmul %93, %43, %cst_35 {dimension_numbers = #tpu.dot_dimension_numbers<[0], [0], [1], [1], [0, 1, 1, 1], [], []>} : vector<8x64xf32>, vector<8x16xf32>, vector<64x16xf32> -> vector<64x16xf32>
    %99 = vector.broadcast %91 : vector<64x1xf32> to vector<64x16xf32>
    %100 = arith.mulf %99, %95 : vector<64x16xf32>
    %101 = arith.addf %100, %98 : vector<64x16xf32>
    %c0_36 = arith.constant 0 : index
    %c0_37 = arith.constant 0 : index
    %102 = vector.load %arg14[%c0_36, %c0_37] : memref<64x16xf32, #tpu.memory_space<vmem>>, vector<64x16xf32>
    tpu.vector_store %arg14[%c0_36, %c0_37], %101 {strides = array<i32>} : memref<64x16xf32, #tpu.memory_space<vmem>>, vector<64x16xf32>,
    %103 = vector.extract_strided_slice %67 {offsets = [0, 0], sizes = [8, 1], strides = [1, 1]} : vector<8x8xf32> to vector<8x1xf32>
    %104 = vector.extract_strided_slice %68 {offsets = [0, 0], sizes = [1, 8], strides = [1, 1]} : vector<8x8xf32> to vector<1x8xf32>
    %105 = vector.broadcast %103 : vector<8x1xf32> to vector<8x8xf32>
    %106 = vector.broadcast %104 : vector<1x8xf32> to vector<8x8xf32>
    %107 = arith.subf %105, %106 : vector<8x8xf32>
    %cst_38 = arith.constant 0.000000e+00 : f32
    %108 = vector.broadcast %cst_38 : f32 to vector<8x8xf32>
    %109 = arith.minimumf %107, %108 : vector<8x8xf32>
    %110 = math.exp %109 : vector<8x8xf32>
    %cst_39 = arith.constant 0.000000e+00 : f32
    %111 = vector.broadcast %cst_39 : f32 to vector<8x8xf32>
    %112 = arith.select %64, %110, %111 : vector<8x8xi1>, vector<8x8xf32>
    %113 = arith.mulf %94, %112 : vector<8x8xf32>
    %114 = vector.extract_strided_slice %92 {offsets = [0, 0], sizes = [8, 8], strides = [1, 1]} : vector<8x64xf32> to vector<8x8xf32>
    %cst_40 = arith.constant dense<0.000000e+00> : vector<8x8xf32>
    %115 = tpu.matmul %113, %114, %cst_40 {dimension_numbers = #tpu.dot_dimension_numbers<[1], [0], [0], [1], [0, 0, 1, 1], [], []>} : vector<8x8xf32>, vector<8x8xf32>, vector<8x8xf32> -> vector<8x8xf32>
    %116 = vector.extract_strided_slice %67 {offsets = [0, 1], sizes = [8, 1], strides = [1, 1]} : vector<8x8xf32> to vector<8x1xf32>
    %117 = vector.extract_strided_slice %68 {offsets = [1, 0], sizes = [1, 8], strides = [1, 1]} : vector<8x8xf32> to vector<1x8xf32>
    %118 = vector.broadcast %116 : vector<8x1xf32> to vector<8x8xf32>
    %119 = vector.broadcast %117 : vector<1x8xf32> to vector<8x8xf32>
    %120 = arith.subf %118, %119 : vector<8x8xf32>
    %cst_41 = arith.constant 0.000000e+00 : f32
    %121 = vector.broadcast %cst_41 : f32 to vector<8x8xf32>
    %122 = arith.minimumf %120, %121 : vector<8x8xf32>
    %123 = math.exp %122 : vector<8x8xf32>
    %cst_42 = arith.constant 0.000000e+00 : f32
    %124 = vector.broadcast %cst_42 : f32 to vector<8x8xf32>
    %125 = arith.select %64, %123, %124 : vector<8x8xi1>, vector<8x8xf32>
    %126 = arith.mulf %94, %125 : vector<8x8xf32>
    %127 = vector.extract_strided_slice %92 {offsets = [0, 8], sizes = [8, 8], strides = [1, 1]} : vector<8x64xf32> to vector<8x8xf32>
    %cst_43 = arith.constant dense<0.000000e+00> : vector<8x8xf32>
    %128 = tpu.matmul %126, %127, %cst_43 {dimension_numbers = #tpu.dot_dimension_numbers<[1], [0], [0], [1], [0, 0, 1, 1], [], []>} : vector<8x8xf32>, vector<8x8xf32>, vector<8x8xf32> -> vector<8x8xf32>
    %129 = vector.extract_strided_slice %67 {offsets = [0, 2], sizes = [8, 1], strides = [1, 1]} : vector<8x8xf32> to vector<8x1xf32>
    %130 = vector.extract_strided_slice %68 {offsets = [2, 0], sizes = [1, 8], strides = [1, 1]} : vector<8x8xf32> to vector<1x8xf32>
    %131 = vector.broadcast %129 : vector<8x1xf32> to vector<8x8xf32>
    %132 = vector.broadcast %130 : vector<1x8xf32> to vector<8x8xf32>
    %133 = arith.subf %131, %132 : vector<8x8xf32>
    %cst_44 = arith.constant 0.000000e+00 : f32
    %134 = vector.broadcast %cst_44 : f32 to vector<8x8xf32>
    %135 = arith.minimumf %133, %134 : vector<8x8xf32>
    %136 = math.exp %135 : vector<8x8xf32>
    %cst_45 = arith.constant 0.000000e+00 : f32
    %137 = vector.broadcast %cst_45 : f32 to vector<8x8xf32>
    %138 = arith.select %64, %136, %137 : vector<8x8xi1>, vector<8x8xf32>
    %139 = arith.mulf %94, %138 : vector<8x8xf32>
    %140 = vector.extract_strided_slice %92 {offsets = [0, 16], sizes = [8, 8], strides = [1, 1]} : vector<8x64xf32> to vector<8x8xf32>
    %cst_46 = arith.constant dense<0.000000e+00> : vector<8x8xf32>
    %141 = tpu.matmul %139, %140, %cst_46 {dimension_numbers = #tpu.dot_dimension_numbers<[1], [0], [0], [1], [0, 0, 1, 1], [], []>} : vector<8x8xf32>, vector<8x8xf32>, vector<8x8xf32> -> vector<8x8xf32>
    %142 = vector.extract_strided_slice %67 {offsets = [0, 3], sizes = [8, 1], strides = [1, 1]} : vector<8x8xf32> to vector<8x1xf32>
    %143 = vector.extract_strided_slice %68 {offsets = [3, 0], sizes = [1, 8], strides = [1, 1]} : vector<8x8xf32> to vector<1x8xf32>
    %144 = vector.broadcast %142 : vector<8x1xf32> to vector<8x8xf32>
    %145 = vector.broadcast %143 : vector<1x8xf32> to vector<8x8xf32>
    %146 = arith.subf %144, %145 : vector<8x8xf32>
    %cst_47 = arith.constant 0.000000e+00 : f32
    %147 = vector.broadcast %cst_47 : f32 to vector<8x8xf32>
    %148 = arith.minimumf %146, %147 : vector<8x8xf32>
    %149 = math.exp %148 : vector<8x8xf32>
    %cst_48 = arith.constant 0.000000e+00 : f32
    %150 = vector.broadcast %cst_48 : f32 to vector<8x8xf32>
    %151 = arith.select %64, %149, %150 : vector<8x8xi1>, vector<8x8xf32>
    %152 = arith.mulf %94, %151 : vector<8x8xf32>
    %153 = vector.extract_strided_slice %92 {offsets = [0, 24], sizes = [8, 8], strides = [1, 1]} : vector<8x64xf32> to vector<8x8xf32>
    %cst_49 = arith.constant dense<0.000000e+00> : vector<8x8xf32>
    %154 = tpu.matmul %152, %153, %cst_49 {dimension_numbers = #tpu.dot_dimension_numbers<[1], [0], [0], [1], [0, 0, 1, 1], [], []>} : vector<8x8xf32>, vector<8x8xf32>, vector<8x8xf32> -> vector<8x8xf32>
    %155 = vector.extract_strided_slice %67 {offsets = [0, 4], sizes = [8, 1], strides = [1, 1]} : vector<8x8xf32> to vector<8x1xf32>
    %156 = vector.extract_strided_slice %68 {offsets = [4, 0], sizes = [1, 8], strides = [1, 1]} : vector<8x8xf32> to vector<1x8xf32>
    %157 = vector.broadcast %155 : vector<8x1xf32> to vector<8x8xf32>
    %158 = vector.broadcast %156 : vector<1x8xf32> to vector<8x8xf32>
    %159 = arith.subf %157, %158 : vector<8x8xf32>
    %cst_50 = arith.constant 0.000000e+00 : f32
    %160 = vector.broadcast %cst_50 : f32 to vector<8x8xf32>
    %161 = arith.minimumf %159, %160 : vector<8x8xf32>
    %162 = math.exp %161 : vector<8x8xf32>
    %cst_51 = arith.constant 0.000000e+00 : f32
    %163 = vector.broadcast %cst_51 : f32 to vector<8x8xf32>
    %164 = arith.select %64, %162, %163 : vector<8x8xi1>, vector<8x8xf32>
    %165 = arith.mulf %94, %164 : vector<8x8xf32>
    %166 = vector.extract_strided_slice %92 {offsets = [0, 32], sizes = [8, 8], strides = [1, 1]} : vector<8x64xf32> to vector<8x8xf32>
    %cst_52 = arith.constant dense<0.000000e+00> : vector<8x8xf32>
    %167 = tpu.matmul %165, %166, %cst_52 {dimension_numbers = #tpu.dot_dimension_numbers<[1], [0], [0], [1], [0, 0, 1, 1], [], []>} : vector<8x8xf32>, vector<8x8xf32>, vector<8x8xf32> -> vector<8x8xf32>
    %168 = vector.extract_strided_slice %67 {offsets = [0, 5], sizes = [8, 1], strides = [1, 1]} : vector<8x8xf32> to vector<8x1xf32>
    %169 = vector.extract_strided_slice %68 {offsets = [5, 0], sizes = [1, 8], strides = [1, 1]} : vector<8x8xf32> to vector<1x8xf32>
    %170 = vector.broadcast %168 : vector<8x1xf32> to vector<8x8xf32>
    %171 = vector.broadcast %169 : vector<1x8xf32> to vector<8x8xf32>
    %172 = arith.subf %170, %171 : vector<8x8xf32>
    %cst_53 = arith.constant 0.000000e+00 : f32
    %173 = vector.broadcast %cst_53 : f32 to vector<8x8xf32>
    %174 = arith.minimumf %172, %173 : vector<8x8xf32>
    %175 = math.exp %174 : vector<8x8xf32>
    %cst_54 = arith.constant 0.000000e+00 : f32
    %176 = vector.broadcast %cst_54 : f32 to vector<8x8xf32>
    %177 = arith.select %64, %175, %176 : vector<8x8xi1>, vector<8x8xf32>
    %178 = arith.mulf %94, %177 : vector<8x8xf32>
    %179 = vector.extract_strided_slice %92 {offsets = [0, 40], sizes = [8, 8], strides = [1, 1]} : vector<8x64xf32> to vector<8x8xf32>
    %cst_55 = arith.constant dense<0.000000e+00> : vector<8x8xf32>
    %180 = tpu.matmul %178, %179, %cst_55 {dimension_numbers = #tpu.dot_dimension_numbers<[1], [0], [0], [1], [0, 0, 1, 1], [], []>} : vector<8x8xf32>, vector<8x8xf32>, vector<8x8xf32> -> vector<8x8xf32>
    %181 = vector.extract_strided_slice %67 {offsets = [0, 6], sizes = [8, 1], strides = [1, 1]} : vector<8x8xf32> to vector<8x1xf32>
    %182 = vector.extract_strided_slice %68 {offsets = [6, 0], sizes = [1, 8], strides = [1, 1]} : vector<8x8xf32> to vector<1x8xf32>
    %183 = vector.broadcast %181 : vector<8x1xf32> to vector<8x8xf32>
    %184 = vector.broadcast %182 : vector<1x8xf32> to vector<8x8xf32>
    %185 = arith.subf %183, %184 : vector<8x8xf32>
    %cst_56 = arith.constant 0.000000e+00 : f32
    %186 = vector.broadcast %cst_56 : f32 to vector<8x8xf32>
    %187 = arith.minimumf %185, %186 : vector<8x8xf32>
    %188 = math.exp %187 : vector<8x8xf32>
    %cst_57 = arith.constant 0.000000e+00 : f32
    %189 = vector.broadcast %cst_57 : f32 to vector<8x8xf32>
    %190 = arith.select %64, %188, %189 : vector<8x8xi1>, vector<8x8xf32>
    %191 = arith.mulf %94, %190 : vector<8x8xf32>
    %192 = vector.extract_strided_slice %92 {offsets = [0, 48], sizes = [8, 8], strides = [1, 1]} : vector<8x64xf32> to vector<8x8xf32>
    %cst_58 = arith.constant dense<0.000000e+00> : vector<8x8xf32>
    %193 = tpu.matmul %191, %192, %cst_58 {dimension_numbers = #tpu.dot_dimension_numbers<[1], [0], [0], [1], [0, 0, 1, 1], [], []>} : vector<8x8xf32>, vector<8x8xf32>, vector<8x8xf32> -> vector<8x8xf32>
    %194 = vector.extract_strided_slice %67 {offsets = [0, 7], sizes = [8, 1], strides = [1, 1]} : vector<8x8xf32> to vector<8x1xf32>
    %195 = vector.extract_strided_slice %68 {offsets = [7, 0], sizes = [1, 8], strides = [1, 1]} : vector<8x8xf32> to vector<1x8xf32>
    %196 = vector.broadcast %194 : vector<8x1xf32> to vector<8x8xf32>
    %197 = vector.broadcast %195 : vector<1x8xf32> to vector<8x8xf32>
    %198 = arith.subf %196, %197 : vector<8x8xf32>
    %cst_59 = arith.constant 0.000000e+00 : f32
    %199 = vector.broadcast %cst_59 : f32 to vector<8x8xf32>
    %200 = arith.minimumf %198, %199 : vector<8x8xf32>
    %201 = math.exp %200 : vector<8x8xf32>
    %cst_60 = arith.constant 0.000000e+00 : f32
    %202 = vector.broadcast %cst_60 : f32 to vector<8x8xf32>
    %203 = arith.select %64, %201, %202 : vector<8x8xi1>, vector<8x8xf32>
    %204 = arith.mulf %94, %203 : vector<8x8xf32>
    %205 = vector.extract_strided_slice %92 {offsets = [0, 56], sizes = [8, 8], strides = [1, 1]} : vector<8x64xf32> to vector<8x8xf32>
    %cst_61 = arith.constant dense<0.000000e+00> : vector<8x8xf32>
    %206 = tpu.matmul %204, %205, %cst_61 {dimension_numbers = #tpu.dot_dimension_numbers<[1], [0], [0], [1], [0, 0, 1, 1], [], []>} : vector<8x8xf32>, vector<8x8xf32>, vector<8x8xf32> -> vector<8x8xf32>
    %207 = tpu.concatenate %115, %128, %141, %154, %167, %180, %193, %206 in 1 : vector<8x8xf32>, vector<8x8xf32>, vector<8x8xf32>, vector<8x8xf32>, vector<8x8xf32>, vector<8x8xf32>, vector<8x8xf32>, vector<8x8xf32> -> vector<8x64xf32>
    %208 = arith.addf %207, %97 : vector<8x64xf32>
    %c0_62 = arith.constant 0 : index
    %c0_63 = arith.constant 0 : index
    %209 = vector.load %arg8[%c0_62, %c0_63] : memref<1x64xf32, #tpu.memory_space<vmem>>, vector<1x64xf32>
    %210 = vector.broadcast %209 : vector<1x64xf32> to vector<8x64xf32>
    %211 = arith.mulf %42, %210 : vector<8x64xf32>
    %212 = arith.addf %208, %211 : vector<8x64xf32>
    %213 = arith.negf %11 : vector<8x64xf32>
    %214 = math.exp %213 : vector<8x64xf32>
    %cst_64 = arith.constant 1.000000e+00 : f32
    %215 = vector.broadcast %cst_64 : f32 to vector<8x64xf32>
    %216 = arith.addf %215, %214 : vector<8x64xf32>
    %217 = arith.divf %215, %216 : vector<8x64xf32>
    %218 = arith.mulf %11, %217 : vector<8x64xf32>
    %219 = arith.mulf %212, %218 : vector<8x64xf32>
    %220 = arith.mulf %219, %219 : vector<8x64xf32>
    %cst_65 = arith.constant dense<0.000000e+00> : vector<8xf32>
    %221 = vector.multi_reduction <add>, %220, %cst_65 [1] : vector<8x64xf32> to vector<8xf32>
    %222 = vector.shape_cast %221 : vector<8xf32> to vector<8x1xf32>
    %cst_66 = arith.constant 6.400000e+01 : f32
    %223 = vector.broadcast %cst_66 : f32 to vector<8x1xf32>
    %224 = arith.divf %222, %223 : vector<8x1xf32>
    %cst_67 = arith.constant 9.99999974E-6 : f32
    %225 = vector.broadcast %cst_67 : f32 to vector<8x1xf32>
    %226 = arith.addf %224, %225 : vector<8x1xf32>
    %227 = math.rsqrt %226 : vector<8x1xf32>
    %228 = vector.broadcast %227 : vector<8x1xf32> to vector<8x64xf32>
    %229 = arith.mulf %219, %228 : vector<8x64xf32>
    %c0_68 = arith.constant 0 : index
    %c0_69 = arith.constant 0 : index
    %230 = vector.load %arg9[%c0_68, %c0_69] : memref<1x64xf32, #tpu.memory_space<vmem>>, vector<1x64xf32>
    %231 = vector.broadcast %230 : vector<1x64xf32> to vector<8x64xf32>
    %232 = arith.mulf %229, %231 : vector<8x64xf32>
    %233 = arith.truncf %232 : vector<8x64xf32> to vector<8x64xbf16>
    %c0_70 = arith.constant 0 : index
    %c0_71 = arith.constant 0 : index
    %234 = vector.load %arg10[%c0_70, %c0_71] : memref<64x32xbf16, #tpu.memory_space<vmem>>, vector<64x32xbf16>
    %cst_72 = arith.constant dense<0.000000e+00> : vector<8x32xf32>
    %235 = tpu.matmul %233, %234, %cst_72 {dimension_numbers = #tpu.dot_dimension_numbers<[1], [0], [0], [1], [0, 0, 1, 1], [], []>} : vector<8x64xbf16>, vector<64x32xbf16>, vector<8x32xf32> -> vector<8x32xf32>
    %c0_73 = arith.constant 0 : index
    %c0_74 = arith.constant 0 : index
    %236 = vector.load %arg11[%c0_73, %c0_74] : memref<1x32xf32, #tpu.memory_space<vmem>>, vector<1x32xf32>
    %237 = vector.broadcast %236 : vector<1x32xf32> to vector<8x32xf32>
    %238 = arith.addf %235, %237 : vector<8x32xf32>
    %c0_75 = arith.constant 0 : index
    %c0_76 = arith.constant 0 : index
    %c0_77 = arith.constant 0 : index
    %c0_78 = arith.constant 0 : index
    %239 = vector.load %arg12[%c0_75, %c0_76, %c0_77, %c0_78] : memref<1x1x8x32xf32, #tpu.memory_space<vmem>>, vector<1x1x8x32xf32>
    %240 = vector.shape_cast %239 : vector<1x1x8x32xf32> to vector<8x32xf32>
    %241 = vector.shape_cast %238 : vector<8x32xf32> to vector<1x1x8x32xf32>
    tpu.vector_store %arg12[%c0_75, %c0_76, %c0_77, %c0_78], %241 {strides = array<i32>} : memref<1x1x8x32xf32, #tpu.memory_space<vmem>>, vector<1x1x8x32xf32>,
    return
  }
  func.func @transform_0(%arg0: i32, %arg1: i32) -> (i32, i32, i32, i32) {
    %c0_i32 = arith.constant 0 : i32
    %c0_i32_0 = arith.constant 0 : i32
    %c0_i32_1 = arith.constant 0 : i32
    return %arg0, %arg1, %c0_i32, %c0_i32_0 : i32, i32, i32, i32
  }
  func.func @transform_1(%arg0: i32, %arg1: i32) -> (i32, i32) {
    %c0_i32 = arith.constant 0 : i32
    %c0_i32_0 = arith.constant 0 : i32
    %c0_i32_1 = arith.constant 0 : i32
    return %c0_i32, %c0_i32_0 : i32, i32
  }
  func.func @transform_2(%arg0: i32, %arg1: i32) -> (i32, i32) {
    %c0_i32 = arith.constant 0 : i32
    %c0_i32_0 = arith.constant 0 : i32
    %c0_i32_1 = arith.constant 0 : i32
    return %c0_i32, %c0_i32_0 : i32, i32
  }
  func.func @transform_3(%arg0: i32, %arg1: i32) -> (i32, i32) {
    %c0_i32 = arith.constant 0 : i32
    %c0_i32_0 = arith.constant 0 : i32
    %c0_i32_1 = arith.constant 0 : i32
    return %c0_i32, %c0_i32_0 : i32, i32
  }
  func.func @transform_4(%arg0: i32, %arg1: i32) -> (i32, i32) {
    %c0_i32 = arith.constant 0 : i32
    %c0_i32_0 = arith.constant 0 : i32
    %c0_i32_1 = arith.constant 0 : i32
    return %c0_i32, %c0_i32_0 : i32, i32
  }
  func.func @transform_5(%arg0: i32, %arg1: i32) -> (i32, i32) {
    %c0_i32 = arith.constant 0 : i32
    %c0_i32_0 = arith.constant 0 : i32
    %c0_i32_1 = arith.constant 0 : i32
    return %c0_i32, %c0_i32_0 : i32, i32
  }
  func.func @transform_6(%arg0: i32, %arg1: i32) -> (i32, i32) {
    %c0_i32 = arith.constant 0 : i32
    %c0_i32_0 = arith.constant 0 : i32
    %c0_i32_1 = arith.constant 0 : i32
    return %c0_i32, %c0_i32_0 : i32, i32
  }
  func.func @transform_7(%arg0: i32, %arg1: i32) -> (i32, i32) {
    %c0_i32 = arith.constant 0 : i32
    %c0_i32_0 = arith.constant 0 : i32
    %c0_i32_1 = arith.constant 0 : i32
    return %c0_i32, %c0_i32_0 : i32, i32
  }
  func.func @transform_8(%arg0: i32, %arg1: i32) -> (i32, i32) {
    %c0_i32 = arith.constant 0 : i32
    %c0_i32_0 = arith.constant 0 : i32
    %c0_i32_1 = arith.constant 0 : i32
    return %c0_i32, %c0_i32_0 : i32, i32
  }
  func.func @transform_9(%arg0: i32, %arg1: i32) -> (i32, i32) {
    %c0_i32 = arith.constant 0 : i32
    %c0_i32_0 = arith.constant 0 : i32
    %c0_i32_1 = arith.constant 0 : i32
    return %c0_i32, %c0_i32_0 : i32, i32
  }
  func.func @transform_10(%arg0: i32, %arg1: i32) -> (i32, i32, i32, i32) {
    %c0_i32 = arith.constant 0 : i32
    %c0_i32_0 = arith.constant 0 : i32
    %c0_i32_1 = arith.constant 0 : i32
    return %arg0, %arg1, %c0_i32, %c0_i32_0 : i32, i32, i32, i32
  }
}

</mosaic_0001>

<bundles_post_ra>
// kernel: mamba2_forward.1
= control target key start
LH: loop header
LB: loop body
LE: loop exit
PB: predicated region body
PF: predicated region fallthrough
CT: control target
= control target key end

     0   :  { %15 = vsyncpa [#allocation5], 0  ;;  %s3777_s0 = inlined_call_operand.vmem [shape: f32[2,2,8,32], index: 0, kind: input, shape index: {}]   ;;  %s3778_s1 = inlined_call_operand.vmem [shape: bf16[32,168], index: 1, kind: input, shape index: {}]   ;;  %s3779_s2 = inlined_call_operand.vmem [shape: f32[1,168], index: 2, kind: input, shape index: {}]   ;;  %s3780_s3 = inlined_call_operand.vmem [shape: f32[4,96], index: 3, kind: input, shape index: {}]   ;;  %s3781_s4 = inlined_call_operand.vmem [shape: f32[1,8], index: 4, kind: input, shape index: {}]   ;;  %s3782_s5 = inlined_call_operand.vmem [shape: f32[1,8], index: 5, kind: input, shape index: {}]   ;;  %s3783_s6 = inlined_call_operand.vmem [shape: f32[1,64], index: 6, kind: input, shape index: {}]   ;;  %s3784_s7 = inlined_call_operand.vmem [shape: f32[1,64], index: 7, kind: input, shape index: {}]   ;;  %s3785_s8 = inlined_call_operand.vmem [shape: bf16[64,32], index: 8, kind: input, shape index: {}]   ;;  %s3786_s9 = inlined_call_operand.vmem [shape: f32[1,32], index: 9, kind: input, shape index: {}]   ;;  %s3787_s10 = inlined_call_operand.hbm [shape: f32[2,2,8,32], index: 10, kind: output, shape index: {}]  }
   0x1   :  { %17 = vsyncpa [#allocation5 + $0x1], 0  ;;  %s3219_s13 = smov 0   ;;  %s3221_s14 = smov 0  }
   0x2   :  { %s3223_s15 = smov 0   ;;  %s3225_s16 = smov 0  }
   0x3   :  { %s3227_s17 = smov 0   ;;  %s3229_s18 = smov 0  }
   0x4   :  { %s3231_s19 = smov 0   ;;  %s3233_s20 = smov 0  }
   0x5 LB: > { %3793 = sst [smem:[#allocation7_spill]] %s3130_s18  ;;  %s2603_s21 = sadd.s32 4294967295, %s3138_s20   ;;  %s3138_s20 = sphi %s3233_s20, %s23_s20   ;;  %s3134_s19 = sphi %s3231_s19, %s3811_s19   ;;  %s3130_s18 = sphi %s3229_s18, %s3810_s18   ;;  %s3126_s17 = sphi %s3227_s17, %s3809_s17   ;;  %s3122_s16 = sphi %s3225_s16, %s3808_s16   ;;  %s3118_s15 = sphi %s3223_s15, %s3814_s15   ;;  %s3114_s14 = sphi %s3221_s14, %s3813_s14   ;;  %s3110_s13 = sphi %s3219_s13, %s3812_s13  }
   0x6   : > { %3794 = sst [smem:[#allocation8_spill]] %s3134_s19  ;;  %s2604_s22 = sadd.s32 4294967294, %s3138_s20  }
   0x7   : > { %s32_s23 = sadd.s32 1, %s3130_s18  ;;  %s35_s24 = sadd.s32 1, %s3134_s19 }
   0x8   : > { %p33_p0 = scmp.ge.s32.totalorder %s32_s23, 2  ;;  %p271_p1 = scmp.ne.s32.totalorder %s3118_s15, %s3114_s14 }
   0x9   : > { %p272_p2 = scmp.eq.s32.totalorder %s2603_s21, 3  ;;  %p277_p5 = scmp.ne.s32.totalorder %s3114_s14, %s3110_s13 }
   0xa   : > { %s3816_s23 = smov (%p33_p0, %s32_s23), 0  ;;  %s3818_s24 = smov (!%p33_p0, %s35_s24), %s3134_s19 }
   0xb   : > { %3795 = sst [smem:[#allocation9_spill]] %s3816_s23  ;;  %s257_s25 = ssub.s32 %s3130_s18, %s3816_s23 }
   0xc   : > { %p3270_p3 = por %p272_p2, %p271_p1  ;;  %p37_p4 = scmp.ge.s32.totalorder %s3818_s24, 2 }
   0xd   : > { %p278_p6 = scmp.eq.s32.totalorder %s2604_s22, 3  ;;  %p2607_p7 = scmp.ge.s32.totalorder %s3138_s20, 1 }
   0xe   : > { %s3820_s24 = smov (%p37_p4, %s3818_s24), 0  ;;  %p334_p9 = scmp.lt.s32.totalorder %s3138_s20, 5 }
   0xf   : > { %3797 = sst [smem:[#allocation10_spill]] %s3820_s24  ;;  %p3279_p8 = por %p278_p6, %p277_p5 }
  0x10   : > { %s256_s28 = ssub.s32 %s3134_s19, %s3820_s24  ;;  %s261_s29 = sadd.s32 1, %s3118_s15 }
  0x11   : > { %s258_s30 = sor.u32 %s257_s25, %s256_s28  ;;  %p335_p10 = pnand %p2607_p7, %p334_p9 }
  0x12   : > { %p259_p11 = scmp.eq.s32.totalorder %s258_s30, 0  ;;  %s3792_s12 = sand.u32 (!%p335_p10), 1, %s3114_s14  }
  0x13   : > { %338 = sbr.rel (%p335_p10) target bundleno = 1996 (0x7cc), region = 60  ;;  %p375_p12 = scmp.lt.s32.totalorder (!%p335_p10), %s3126_s17, 1 }
  0x14   : > { %s3288_s11 = scalar_select %p259_p11, %s3118_s15, %s261_s29  }
  0x15   : > { %s3294_s21 = sshll.u32 (!%p335_p10), %s3792_s12, 3  ;;  %p377_p13 = scmp.lt.s32.totalorder (!%p335_p10), %s3122_s16, 1 }
  0x16   : > { %p2611_p0 = scmp.ne.s32.totalorder (!%p335_p10), %s3122_s16, 0 }
  0x1a   : > { %s376_s22 = scalar_select %p375_p12, %s3126_s17, 1 }
  0x1b   : > { %s378_s25 = scalar_select %p377_p13, %s3122_s16, 1 }
  0x1c   : > { %s2609_s28 = sshll.u32 %s376_s22, 1  ;;  %387 = sbr.rel (%p2611_p0) target bundleno = 35 (0x23), region = 64  ;;  %vm388_vm0 = vcmask (!%p2611_p0), 785408   ;;  %vm390_vm1 = vcmask (!%p2611_p0), 130048   ;;  %v3140_v0 = vmov (!%p2611_p0), 0.0  }
  0x1d   : > { %s380_s30 = sadd.s32 %s2609_s28, %s378_s25  ;;  %389 = vst.msk [vmem:[#allocation2] sm:$0xff] (!%p2611_p0), %vm388_vm0, %v3140_v0 }
  0x1e   : > { %s2610_s29 = sshll.u32 %s380_s30, 3  ;;  %391 = vst.msk [vmem:[#allocation3] sm:$0xff] (!%p2611_p0), %vm390_vm1, %v3140_v0  ;;  %392 = vst.msk [vmem:[#allocation3 + $0x8] sm:$0xff] (!%p2611_p0), %vm390_vm1, %v3140_v0 }
  0x1f   : > { %s382_s19 = scalar_lea.vmem %s3777_s0, %s2610_s29  ;;  %393 = vst.msk [vmem:[#allocation3 + $0x10] sm:$0xff] (!%p2611_p0), %vm390_vm1, %v3140_v0  ;;  %394 = vst.msk [vmem:[#allocation3 + $0x18] sm:$0xff] (!%p2611_p0), %vm390_vm1, %v3140_v0 }
  0x20   : > { %395 = vst.msk [vmem:[#allocation3 + $0x20] sm:$0xff] (!%p2611_p0), %vm390_vm1, %v3140_v0  ;;  %396 = vst.msk [vmem:[#allocation3 + $0x28] sm:$0xff] (!%p2611_p0), %vm390_vm1, %v3140_v0 }
  0x21   : > { %397 = vst.msk [vmem:[#allocation3 + $0x30] sm:$0xff] (!%p2611_p0), %vm390_vm1, %v3140_v0  ;;  %398 = vst.msk [vmem:[#allocation3 + $0x38] sm:$0xff] (!%p2611_p0), %vm390_vm1, %v3140_v0 }
  0x23 PF: > { %v2994_v1 = vld [vmem:[%s3778_s1 + $0x4] ss:$8 sps:$4 sm:$0xff]   ;;  %v2996_v2 = vld [vmem:[%s3778_s1] ss:$8 sps:$4 sm:$0xff]   ;;  %v3141_v3 = vmov 0   ;;  %s3142_s18 = smov 32   ;;  %v407_v11 = vlaneseq }
  0x24   : > { %473 = vmatprep.mubr.bf16.mxu0 %v3141_v3  ;;  %441 = vmatprep.subr.bf16.mxu0 %v2994_v1  ;;  %v2997_v4 = vld [vmem:[%s3778_s1 + $0x14] ss:$8 sps:$4 sm:$0xff]   ;;  %v2999_v5 = vld [vmem:[%s3778_s1 + $0x10] ss:$8 sps:$4 sm:$0xff]   ;;  %v399_v6 = vld [vmem:[%s382_s19] sm:$0xff]  ;;  %vm437_vm2 = vcmask 261120  }
  0x25   : > { %442 = vmatpush1.bf16.msra.mxu0 %v2996_v2  ;;  %v2623_v7 = vld [vmem:[%s3782_s5] ss:$0 sm:$0xff]  ;;  %v400_v10 = vpack.c.bf16 %v399_v6, %v399_v6  ;;  %v3325_v12 = vshrl.u32 %v407_v11, 7  ;;  %v3143_v19 = vmov 0.0   ;;  %s3144_s28 = smov 64   ;;  %v614_v38 = vand.u32 127, %v407_v11 }
  0x26   : > { %v598_v8 = vld [vmem:[%s3781_s4] sm:$0x1]  ;;  %443 = vmatprep.subr.bf16.mxu0 %v2997_v4  ;;  %579 = vrot.lane.b32.xlu0 %v2623_v7, %s3142_s18  ;;  %v2617_v30 = vld [vmem:[%s3780_s3 + $0x3] ss:$0 sm:$0xff]  ;;  %vm3145_vm3 = vmmov 0   ;;  %v3146_v44 = vmov 1.0  }
  0x27   : > { %v599_v9 = vmul.f32 1.442695, %v598_v8  ;;  %v3328_v13 = vsub.s32 0, %v3325_v12  ;;  %v405_v17 = vld [vmem:[%s3779_s2] sm:$0x3]  ;;  %v413_v18 = vsub.s32 1, %v3325_v12  ;;  %2755 = vmatprep.subr.mxu1 %v3143_v19  ;;  %2757 = vmatprep.mubr.msk.f32.mxu1 %vm3145_vm3, %v3143_v19  ;;  %vm3369_vm8 = vcmp.ge.s32.totalorder %v3325_v12, %v614_v38 }
  0x28   : > { %v812_v36 = vadd.s32 1, %v3325_v12  ;;  %v810_v39 = vmul.u32 8, %v3325_v12  ;;  %s3147_s22 = smov 96   ;;  %v2624_v54 = vsel %vm3369_vm8, 1.0, %v3143_v19  ;;  %vm622_vm9 = vcmask 64512   ;;  %v482_v56 = vld [vmem:[#allocation2] sm:$0xff] }
  0x29   : > { %3004 = vpow2.f32 %v599_v9  ;;  %444 = vmatpush1.bf16.msra.mxu0 %v2999_v5  ;;  %v410_v20 = vrot.slane %v405_v17, %v3328_v13  ;;  %v414_v21 = vrot.slane %v405_v17, %v413_v18  ;;  %v2619_v57 = vld [vmem:[%s3780_s3 + $0x1] ss:$0 sm:$0xff]  ;;  %v2618_v58 = vld [vmem:[%s3780_s3] ss:$0 sm:$0xff]  ;;  %vm489_vm10 = vcmask 523264   ;;  %s3150_s29 = smov 112  }
  0x2a   : > { %2745 = vmatprep.subr.mxu0 %v3143_v19  ;;  %v813_v40 = vmul.u32 8, %v812_v36  ;;  %vm811_vm4 = vcmp.ge.s32.totalorder %v614_v38, %v810_v39  ;;  %v526_v60 = vmul.f32 %v2619_v57, %v482_v56  ;;  %v2620_v61 = vld [vmem:[%s3780_s3 + $0x2] ss:$0 sm:$0xff]  ;;  %v508_v62 = vmul.f32 %v2618_v58, %v482_v56  ;;  %s3156_s23 = smov 40   ;;  %s3159_s24 = smov 48   ;;  %v3521_v53 = vld [vmem:[#allocation3] sm:$0xff] }
  0x2b   : > { %vm571_vm11 = vcmask 785413   ;;  %v544_v4 = vmul.f32 %v2620_v61, %v482_v56  ;;  %vm530_vm12 = vcmask 1041408   ;;  %vm512_vm13 = vcmask 1042432   ;;  %s3160_s25 = smov 24   ;;  %s3161_s19 = smov 8  }
  0x2c   : > { %2616 = vmatmul.mubr.msk.bf16.vlgmr.msra.gmra.mrb[0].mxu0 %vm437_vm2, %v400_v10  ;;  %vm814_vm5 = vcmp.lt.s32.totalorder %v614_v38, %v813_v40  ;;  %v531_v2 = vrot.slane %v526_v60, 6  ;;  %v513_v8 = vrot.slane %v508_v62, 5  ;;  %vm548_vm14 = vcmask 1040384   ;;  %s3162_s12 = smov 16  }
  0x2d   : > { %2747 = vmatprep.mubr.msk.f32.mxu0 %vm3145_vm3, %v3143_v19  ;;  %vm3358_vm6 = vmand %vm811_vm4, %vm814_vm5  ;;  %vm1216_vm15 = vcmask 130048   ;;  %v3152_v56 = vmov 3   ;;  %v3154_v62 = vmov 6   ;;  %vm2375_vm1 = vcmask 195584  }
  0x2e   : > { %2756 = vmatpush3.msk.msra.mxu1 %vm3358_vm6, %v3146_v44  ;;  %vm3530_vm0 = vmpackc.low %vm1216_vm15, %vm1216_vm15  ;;  %vm2380_vm4 = vcmask 392192   ;;  %vm2382_vm5 = vcmask 457728  }
  0x2f   : > { %2760 = vmatprep.subr.mxu1 %v3143_v19 }
  0x33   : > { %v3005_v14 = vpop.eup %3004 }
  0x34   : > { %v601_v15 = vsub.f32 0.0, %v3005_v14 }
  0x36   : > { %v606_v16 = vrot.slane %v601_v15, %v3328_v13  ;;  %v549_v15 = vrot.slane %v544_v4, 7 }
  0x38   : > { %607 = vrot.lane.b32.xlu0 %v606_v16, %s3142_s18 }
  0x98   : > { %v580_v25 = vpop.permute.xlu0 %579 }
  0xaa   : > { %v608_v49 = vpop.permute.xlu0 %607 }
  0xff   : > { %v475_v22 = vpop.f32.mrb[0].mxu0 }
 0x100   : > { %v3341_v23 = vadd.f32 %v475_v22, %v410_v20  ;;  %v477_v24 = vpop.f32.mrb[1].mxu0  ;;  %v3148_v20 = vmov 4  }
 0x101   : > { %v3343_v26 = vadd.f32 %v477_v24, %v414_v21  ;;  %v479_v27 = vpop.f32.mrb[2].mxu0  ;;  %v3149_v21 = vmov 1  }
 0x102   : > { %v480_v28 = vpop.f32.mrb[3].mxu0  ;;  %485 = vrot.lane.b32.xlu0 %v3341_v23, %s3144_s28 }
 0x103   : > { %v582_v29 = vadd.f32 %v580_v25, %v3343_v26  ;;  %2984 = vset.pattern.permute.xlu0 %v3149_v21 }
 0x105   : > { %v584_v31 = vand.u32 2147483647, %v582_v29  ;;  %v583_v48 = vmax.f32 %v582_v29, 0.0 }
 0x106   : > { %498 = vrot.lane.b32.xlu0 %v2617_v30, %s3144_s28 }
 0x107   : > { %v585_v32 = vsub.f32 0.0, %v584_v31 }
 0x109   : > { %v586_v33 = vmul.f32 1.442695, %v585_v32 }
 0x10b   : > { %3006 = vpow2.f32 %v586_v33 }
 0x115   : > { %v3007_v34 = vpop.eup %3006 }
 0x116   : > { %v588_v35 = vadd.f32 1.0, %v3007_v34  ;;  %v591_v37 = vmul.f32 -0.5, %v3007_v34  ;;  %v594_v43 = vand.u32 2147483647, %v3007_v34 }
 0x118   : > { %3008 = vlog2.f32 %v588_v35  ;;  %v592_v41 = vadd.f32 1.0, %v591_v37  ;;  %vm595_vm7 = vcmp.lt.f32.partialorder %v594_v43, 0.0004427343 }
 0x11a   : > { %v593_v47 = vmul.f32 %v3007_v34, %v592_v41 }
 0x122   : > { %v3009_v45 = vpop.eup %3008 }
 0x123   : > { %v590_v46 = vmul.f32 0.6931472, %v3009_v45 }
 0x125   : > { %v596_v50 = vsel %vm595_vm7, %v593_v47, %v590_v46 }
 0x126   : > { %v597_v51 = vadd.f32 %v596_v50, %v583_v48 }
 0x128   : > { %v610_v52 = vmul.f32 %v608_v49, %v597_v51 }
 0x12a   : > { %619 = vrot.lane.b32.xlu1 %v610_v52, %s3147_s22 }
 0x12e   : > { %819 = vrot.lane.b32.xlu1 %v597_v51, %s3147_s22  ;;  %v3151_v51 = vmov 2   ;;  %s3155_s22 = smov 56  }
 0x132   : > { %487 = vrot.lane.b32.xlu1 %v3343_v26, %s3144_s28 }
 0x174   : > { %v486_v63 = vpop.permute.xlu0 %485 }
 0x178   : > { %v499_v22 = vpop.permute.xlu0 %498 }
 0x179   : > { %v501_v24 = vmul.f32 %v499_v22, %v3341_v23  ;;  %v502_v25 = vmul.f32 %v499_v22, %v3343_v26  ;;  %v803_v26 = vsub.s32 7, %v3325_v12 }
 0x19c   : > { %v620_v55 = vpop.permute.xlu1 %619 }
 0x19d   : > { %2746 = vmatpush3.msra.mxu0 %v620_v55 }
 0x19e   : > { %2748 = vmatmul.mubr.msk.f32.vlgmr.msra.gmra.mrb[4].mxu0 %vm622_vm9, %v2624_v54  ;;  %2750 = vmatprep.subr.mxu0 %v3143_v19 }
 0x19f   : > { %2752 = vmatprep.mubr.msk.f32.mxu0 %vm3145_vm3, %v3143_v19 }
 0x1a0   : > { %v820_v59 = vpop.permute.xlu1 %819 }
 0x1a1   : > { %2758 = vmatmul.mubr.msk.f32.vlgmr.msra.gmra.mrb[0].mxu1 %vm622_vm9, %v820_v59 }
 0x1a2   : > { %2761 = vmatpush3.msk.msra.mxu1 %vm3358_vm6, %v3146_v44  ;;  %2762 = vmatprep.mubr.msk.f32.mxu1 %vm3145_vm3, %v3143_v19 }
 0x1a4   : > { %v488_v0 = vpop.permute.xlu1 %487  ;;  %2751 = vmatpush3.xpose.msk.msra.mxu0 %vm622_vm9, %v2624_v54 }
 0x1a5   : > { %v490_v1 = vsel %vm489_vm10, %v486_v63, %v488_v0  ;;  %2765 = vmatprep.subr.mxu0 %v3143_v19 }
 0x1a6   : > { %v509_v5 = vmul.f32 %v2618_v58, %v490_v1  ;;  %v527_v6 = vmul.f32 %v2619_v57, %v490_v1  ;;  %v545_v7 = vmul.f32 %v2620_v61, %v490_v1  ;;  %572 = vst.msk [vmem:[#allocation2] sm:$0xe0] %vm571_vm11, %v490_v1  ;;  %v3153_v57 = vmov 5  }
 0x1a8   : > { %v532_v9 = vrot.slane %v527_v6, 6  ;;  %v514_v10 = vrot.slane %v509_v5, 5  ;;  %v550_v16 = vrot.slane %v545_v7, 7  ;;  %v1811_v6 = vsub.s32 2, %v3325_v12 }
 0x1a9   : > { %v1901_v7 = vsub.s32 3, %v3325_v12 }
 0x1aa   : > { %v533_v11 = vsel %vm530_vm12, %v531_v2, %v532_v9  ;;  %v515_v14 = vsel %vm512_vm13, %v513_v8, %v514_v10  ;;  %v551_v17 = vsel %vm548_vm14, %v549_v15, %v550_v16 }
 0x1ab   : > { %534 = vrot.lane.b32.xlu0 %v533_v11, %s3144_s28  ;;  %516 = vrot.lane.b32.xlu1 %v515_v14, %s3144_s28 }
 0x1af   : > { %552 = vrot.lane.b32.xlu1 %v551_v17, %s3144_s28 }
 0x1d8   : > { %696 = vxpose.xlu1.b32.start.end [1/1] (short) (narrow) %v620_v55, 8 }
 0x1f6   : > { %2987 = vset.pattern.permute.xlu1 %v3148_v20 }
 0x21d   : > { %v517_v27 = vpop.permute.xlu1 %516  ;;  %v535_v30 = vpop.permute.xlu0 %534 }
 0x21e   : > { %v519_v28 = vadd.f32 %v517_v27, %v501_v24  ;;  %v520_v29 = vadd.f32 %v517_v27, %v502_v25  ;;  %v3157_v27 = vmov 7  }
 0x220   : > { %v537_v31 = vadd.f32 %v535_v30, %v519_v28  ;;  %v538_v32 = vadd.f32 %v535_v30, %v520_v29  ;;  %v2081_v28 = vsub.s32 5, %v3325_v12 }
 0x221   : > { %v553_v33 = vpop.permute.xlu1 %552 }
 0x222   : > { %v555_v34 = vadd.f32 %v553_v33, %v537_v31  ;;  %v556_v35 = vadd.f32 %v553_v33, %v538_v32 }
 0x224   : > { %v2622_v36 = vmul.f32 -1.442695, %v556_v35  ;;  %v2621_v59 = vmul.f32 -1.442695, %v555_v34 }
 0x226   : > { %3010 = vpow2.f32 %v2622_v36 }
 0x230   : > { %v3011_v37 = vpop.eup %3010 }
 0x231   : > { %v564_v38 = vadd.f32 1.0, %v3011_v37 }
 0x233   : > { %3012 = vrcp.f32 %v564_v38 }
 0x23d   : > { %v3013_v39 = vpop.eup %3012 }
 0x23e   : > { %v570_v40 = vmul.f32 %v3013_v39, %v556_v35 }
 0x240   : > { %1214 = vrot.lane.b32.xlu0 %v570_v40, %s3150_s29 }
 0x258   : > { %v712_v41 = vpop.trf.xlu1 }
 0x259   : > { %2753 = vmatmul.mubr.msk.f32.vlgmr.msra.gmra.mrb[6].mxu0 %vm622_vm9, %v712_v41 }
 0x25a   : > { %2766 = vmatpush3.msk.msra.mxu0 %vm3358_vm6, %v3146_v44  ;;  %2767 = vmatprep.mubr.msk.f32.mxu0 %vm3145_vm3, %v3143_v19 }
 0x25b   : > { %2784 = vmatprep.subr.mxu0 %v3143_v19 }
 0x271   : > { %v3411_v43 = vpop.f32.mrb[4].mxu0 }
 0x272   : > { %v804_v45 = vrot.slane %v3411_v43, %v803_v26  ;;  %v808_v46 = vmul.f32 1.442695, %v3411_v43  ;;  %v2749_v47 = vpop.f32.mrb[5].mxu0  ;;  %1986 = vperm.xlu1 %2987, %v3411_v43  }
 0x274   : > { %v805_v44 = vsub.f32 %v804_v45, %v3411_v43  ;;  %3014 = vpow2.f32 %v808_v46  ;;  %v889_v48 = vpop.f32.mrb[0].mxu1 }
 0x275   : > { %v2759_v49 = vpop.f32.mrb[1].mxu1  ;;  %1204 = vrot.lane.b32.xlu0 %v889_v48, %s3144_s28 }
 0x276   : > { %v806_v50 = vmul.f32 1.442695, %v805_v44 }
 0x278   : > { %3016 = vpow2.f32 %v806_v50 }
 0x279   : > { %1716 = vperm.xlu0 %2984, %v3411_v43   ;;  %3018 = vpow2.f32 %v2621_v59 }
 0x27d   : > { %2985 = vset.pattern.permute.xlu0 %v3151_v51 }
 0x27e   : > { %v3015_v52 = vpop.eup %3014  ;;  %1806 = vperm.xlu0 %2985, %v3411_v43  }
 0x27f   : > { %2768 = vmatmul.mubr.msk.f32.vlgmr.msra.gmra.mrb[8].mxu0 %vm622_vm9, %v3015_v52  ;;  %v1071_v54 = vrot.slane %v3015_v52, 7 }
 0x280   : > { %2785 = vmatpush3.xpose.msk.msra.mxu0 %vm1216_vm15, %v570_v40  ;;  %2786 = vmatprep.mubr.msk.f32.mxu0 %vm3145_vm3, %v3143_v19 }
 0x281   : > { %2808 = vmatprep.subr.mxu0 %v570_v40  ;;  %2770 = vmatprep.subr.msk.mxu1 %vm622_vm9, %v1071_v54 }
 0x282   : > { %v3017_v55 = vpop.eup %3016  ;;  %2986 = vset.pattern.permute.xlu0 %v3152_v56 }
 0x283   : > { %2763 = vmatmul.mubr.msk.f32.vlgmr.msra.gmra.mrb[2].mxu1 %vm622_vm9, %v3017_v55  ;;  %1896 = vperm.xlu0 %2986, %v3411_v43   ;;  %v3019_v60 = vpop.eup %3018 }
 0x284   : > { %2771 = vmatpush3.xpose.msk.msra.mxu1 %vm622_vm9, %v1071_v54  ;;  %v563_v61 = vadd.f32 1.0, %v3019_v60 }
 0x286   : > { %3020 = vrcp.f32 %v563_v61 }
 0x287   : > { %2988 = vset.pattern.permute.xlu0 %v3153_v57 }
 0x288   : > { %2076 = vperm.xlu0 %2988, %v3411_v43  }
 0x28c   : > { %2989 = vset.pattern.permute.xlu0 %v3154_v62 }
 0x290   : > { %v3021_v63 = vpop.eup %3020 }
 0x291   : > { %v3436_v0 = vmul.f32 %v3021_v63, %v555_v34 }
 0x2b2   : > { %v3431_v58 = vpop.permute.xlu0 %1214 }
 0x2b3   : > { %2787 = vmatmul.mubr.msk.f32.vlgmr.msra.gmra.mrb[10].mxu0 %vm1216_vm15, %v3431_v58 }
 0x2b4   : > { %2809 = vmatpush3.msra.mxu0 %v570_v40 }
 0x2b5   : > { %2822 = vmatprep.subr.mxu0 %v3143_v19 }
 0x2e7   : > { %v1205_v1 = vpop.permute.xlu0 %1204 }
 0x2e8   : > { %v3439_v2 = vmul.f32 %v1205_v1, %v3436_v0 }
 0x2ea   : > { %1639 = vrot.lane.b32.xlu1 %v3439_v2, %s3144_s28 }
 0x2ee   : > { %1729 = vrot.lane.b32.xlu1 %v3439_v2, %s3155_s22 }
 0x2f1   : > { %v1987_v31 = vpop.permute.xlu1 %1986 }
 0x2f2   : > { %1909 = vrot.lane.b32.xlu1 %v3439_v2, %s3156_s23 }
 0x2f8   : > { %v1717_v4 = vpop.permute.xlu0 %1716 }
 0x2fd   : > { %v1807_v5 = vpop.permute.xlu0 %1806 }
 0x302   : > { %v1897_v15 = vpop.permute.xlu0 %1896 }
 0x307   : > { %v2077_v32 = vpop.permute.xlu0 %2076 }
 0x32c   : > { %v3449_v8 = vpop.f32.mrb[6].mxu0 }
 0x32d   : > { %v1722_v9 = vrot.slane %v3449_v8, %v413_v18  ;;  %v1812_v10 = vrot.slane %v3449_v8, %v1811_v6  ;;  %v1902_v11 = vrot.slane %v3449_v8, %v1901_v7  ;;  %v2754_v14 = vpop.f32.mrb[7].mxu0  ;;  %v1991_v18 = vsub.s32 4, %v3325_v12 }
 0x32e   : > { %v2082_v30 = vrot.slane %v3449_v8, %v2081_v28  ;;  %v2171_v6 = vsub.s32 6, %v3325_v12  ;;  %v2628_v12 = vsel %vm3358_vm6, 1.0, %v3143_v19 }
 0x32f   : > { %v1723_v16 = vsub.f32 %v1717_v4, %v1722_v9  ;;  %v1813_v17 = vsub.f32 %v1807_v5, %v1812_v10  ;;  %v1903_v20 = vsub.f32 %v1897_v15, %v1902_v11  ;;  %v1992_v29 = vrot.slane %v3449_v8, %v1991_v18 }
 0x330   : > { %v2083_v35 = vsub.f32 %v2077_v32, %v2082_v30  ;;  %v2172_v7 = vrot.slane %v3449_v8, %v2171_v6  ;;  %v2262_v11 = vrot.slane %v3449_v8, %v803_v26  ;;  %v3158_v30 = vmov 0.0|0.0  }
 0x331   : > { %v1993_v33 = vsub.f32 %v1987_v31, %v1992_v29  ;;  %v1724_v34 = vmin.f32 %v1723_v16, 0.0  ;;  %v1814_v36 = vmin.f32 %v1813_v17, 0.0  ;;  %v1904_v37 = vmin.f32 %v1903_v20, 0.0  ;;  %2874 = vmatprep.subr.bf16.mxu1 %v3158_v30 }
 0x332   : > { %v2084_v40 = vmin.f32 %v2083_v35, 0.0  ;;  %v1631_v20 = vrot.slane %v3449_v8, %v3328_v13 }
 0x333   : > { %v1994_v38 = vmin.f32 %v1993_v33, 0.0  ;;  %v1725_v39 = vmul.f32 1.442695, %v1724_v34  ;;  %v1815_v41 = vmul.f32 1.442695, %v1814_v36 }
 0x334   : > { %v1905_v45 = vmul.f32 1.442695, %v1904_v37  ;;  %v3523_v37 = vld [vmem:[#allocation3 + $0x8] sm:$0xff] }
 0x335   : > { %v1995_v46 = vmul.f32 1.442695, %v1994_v38  ;;  %3022 = vpow2.f32 %v1725_v39  ;;  %v2875_v39 = vpack.c.bf16 %v3523_v37, %v3521_v53 }
 0x336   : > { %3024 = vpow2.f32 %v1815_v41 }
 0x337   : > { %3026 = vpow2.f32 %v1905_v45  ;;  %v3539_v45 = vld [vmem:[#allocation3 + $0x18] sm:$0xff] }
 0x338   : > { %3028 = vpow2.f32 %v1995_v46 }
 0x33f   : > { %v3023_v47 = vpop.eup %3022 }
 0x340   : > { %v3025_v44 = vpop.eup %3024  ;;  %v1727_v51 = vsel %vm3369_vm8, %v3023_v47, 0.0 }
 0x341   : > { %v3027_v48 = vpop.eup %3026  ;;  %v1817_v55 = vsel %vm3369_vm8, %v3025_v44, 0.0  ;;  %v3549_v44 = vld [vmem:[#allocation3 + $0x20] sm:$0xff] }
 0x342   : > { %v3029_v49 = vpop.eup %3028  ;;  %v1907_v56 = vsel %vm3369_vm8, %v3027_v48, 0.0  ;;  %v3551_v48 = vld [vmem:[#allocation3 + $0x28] sm:$0xff] }
 0x343   : > { %v1997_v54 = vsel %vm3369_vm8, %v3029_v49, 0.0  ;;  %v2671_v49 = vld [vmem:[%s3783_s6] ss:$0 sm:$0xff] }
 0x352   : > { %v3456_v21 = vpop.f32.mrb[8].mxu0 }
 0x353   : > { %v2769_v22 = vpop.f32.mrb[9].mxu0 }
 0x356   : > { %v962_v24 = vpop.f32.mrb[2].mxu1 }
 0x357   : > { %1209 = vrot.lane.b32.xlu0 %v962_v24, %s3144_s28  ;;  %v2764_v25 = vpop.f32.mrb[3].mxu1 }
 0x35b   : > { %2166 = vperm.xlu0 %2989, %v3411_v43  }
 0x35f   : > { %2990 = vset.pattern.permute.xlu0 %v3157_v27 }
 0x360   : > { %2256 = vperm.xlu0 %2990, %v3411_v43  }
 0x364   : > { %2991 = vset.pattern.permute.xlu0 %v3141_v3 }
 0x365   : > { %1625 = vperm.xlu0 %2991, %v3411_v43   ;;  %v2085_v43 = vmul.f32 1.442695, %v2084_v40 }
 0x367   : > { %3030 = vpow2.f32 %v2085_v43 }
 0x371   : > { %v3031_v50 = vpop.eup %3030 }
 0x372   : > { %v2087_v57 = vsel %vm3369_vm8, %v3031_v50, 0.0 }
 0x386   : > { %v1287_v52 = vpop.f32.mrb[10].mxu0 }
 0x387   : > { %v2788_v59 = vpop.f32.mrb[11].mxu0  ;;  %v3478_v60 = vmul.f32 %v1997_v54, %v1287_v52  ;;  %v3480_v61 = vmul.f32 %v1727_v51, %v1287_v52  ;;  %v3482_v62 = vmul.f32 %v1817_v55, %v1287_v52  ;;  %v3484_v63 = vmul.f32 %v1907_v56, %v1287_v52  ;;  %v3565_v54 = vld [vmem:[#allocation3 + $0x38] sm:$0xff] }
 0x388   : > { %v3486_v1 = vmul.f32 %v2087_v57, %v1287_v52  ;;  %v2883_v51 = vpack.c.bf16 %v3551_v48, %v3549_v44 }
 0x3c9   : > { %v1210_v4 = vpop.permute.xlu0 %1209 }
 0x3ca   : > { %v1212_v5 = vmul.f32 %v1210_v4, %v3439_v2 }
 0x3cc   : > { %1395 = vrot.lane.b32.xlu0 %v1212_v5, %s3144_s28  ;;  %v1640_v5 = vpop.permute.xlu1 %1639 }
 0x3d0   : > { %v1730_v6 = vpop.permute.xlu1 %1729 }
 0x3da   : > { %v2167_v9 = vpop.permute.xlu0 %2166 }
 0x3db   : > { %v2173_v10 = vsub.f32 %v2167_v9, %v2172_v7  ;;  %v1910_v7 = vpop.permute.xlu1 %1909 }
 0x3dd   : > { %v2174_v14 = vmin.f32 %v2173_v10, 0.0 }
 0x3df   : > { %v2175_v15 = vmul.f32 1.442695, %v2174_v14  ;;  %v2257_v16 = vpop.permute.xlu0 %2256 }
 0x3e0   : > { %v2263_v17 = vsub.f32 %v2257_v16, %v2262_v11 }
 0x3e1   : > { %3032 = vpow2.f32 %v2175_v15 }
 0x3e2   : > { %v2264_v22 = vmin.f32 %v2263_v17, 0.0 }
 0x3e4   : > { %v2265_v24 = vmul.f32 1.442695, %v2264_v22  ;;  %v1626_v25 = vpop.permute.xlu0 %1625 }
 0x3e5   : > { %v1632_v18 = vsub.f32 %v1626_v25, %v1631_v20 }
 0x3e6   : > { %3034 = vpow2.f32 %v2265_v24 }
 0x3e7   : > { %v1633_v28 = vmin.f32 %v1632_v18, 0.0 }
 0x3e9   : > { %v1634_v29 = vmul.f32 1.442695, %v1633_v28 }
 0x3ea   : > { %1039 = vxpose.xlu0.b32.start.end [1/1] (short) (narrow) %v2628_v12, 64 }
 0x3eb   : > { %v3033_v26 = vpop.eup %3032  ;;  %3036 = vpow2.f32 %v1634_v29 }
 0x3ec   : > { %v2177_v31 = vsel %vm3369_vm8, %v3033_v26, 0.0 }
 0x3ed   : > { %v3502_v13 = vmul.f32 %v2177_v31, %v1287_v52 }
 0x3f0   : > { %v3035_v8 = vpop.eup %3034 }
 0x3f1   : > { %v2267_v32 = vsel %vm3369_vm8, %v3035_v8, 0.0 }
 0x3f2   : > { %v3506_v33 = vmul.f32 %v2267_v32, %v1287_v52 }
 0x3f5   : > { %v3037_v34 = vpop.eup %3036 }
 0x3f6   : > { %v1636_v42 = vsel %vm3369_vm8, %v3037_v34, 0.0 }
 0x3f7   : > { %v3510_v35 = vmul.f32 %v1636_v42, %v1287_v52 }
 0x42f   : > { %1819 = vrot.lane.b32.xlu0 %v3439_v2, %s3159_s24 }
 0x433   : > { %1999 = vrot.lane.b32.xlu0 %v3439_v2, %s3142_s18 }
 0x437   : > { %2089 = vrot.lane.b32.xlu0 %v3439_v2, %s3160_s25 }
 0x43b   : > { %2269 = vrot.lane.b32.xlu0 %v3439_v2, %s3161_s19 }
 0x43e   : > { %v1396_v36 = vpop.permute.xlu0 %1395 }
 0x43f   : > { %1398 = vxpose.xlu1.b32.start.end [1/1] (short) (narrow) %v1396_v36, 64 }
 0x45d   : > { %2992 = vset.pattern.permute.xlu1 %v3141_v3  ;;  %v3537_v3 = vld [vmem:[#allocation3 + $0x10] sm:$0xff] }
 0x45e   : > { %v2879_v43 = vpack.c.bf16 %v3539_v45, %v3537_v3 }
 0x46a   : > { %v1055_v38 = vpop.trf.xlu0 }
 0x46b   : > { %2772 = vmatprep.mubr.msk.f32.mxu1 %vm622_vm9, %v1055_v38 }
 0x46e   : > { %v1056_v41 = vpop.trf.xlu0 }
 0x46f   : > { %2773 = vmatmul.mubr.msk.f32.vlgmr.msra.gmra.mrb[4].mxu1 %vm622_vm9, %v1056_v41 }
 0x470   : > { %2877 = vmatpush3.bf16.xpose.msk.msra.mxu1 %vm3530_vm0, %v2875_v39 }
 0x471   : > { %2878 = vmatprep.subr.bf16.mxu1 %v3158_v30 }
 0x472   : > { %v1057_v46 = vpop.trf.xlu0 }
 0x473   : > { %2775 = vmatprep.mubr.msk.f32.mxu1 %vm622_vm9, %v1057_v46 }
 0x476   : > { %v1058_v47 = vpop.trf.xlu0 }
 0x477   : > { %2776 = vmatmul.mubr.msk.f32.gmra.mrb[6].mxu1 %vm622_vm9, %v1058_v47 }
 0x478   : > { %2881 = vmatpush3.bf16.xpose.msk.msra.mxu1 %vm3530_vm0, %v2879_v43 }
 0x479   : > { %2179 = vrot.lane.b32.xlu1 %v3439_v2, %s3162_s12  ;;  %2882 = vmatprep.subr.bf16.mxu1 %v3158_v30  ;;  %v3563_v2 = vld [vmem:[#allocation3 + $0x30] sm:$0xff] }
 0x47a   : > { %v1059_v50 = vpop.trf.xlu0  ;;  %v2887_v56 = vpack.c.bf16 %v3565_v54, %v3563_v2 }
 0x47b   : > { %2778 = vmatprep.mubr.msk.f32.mxu1 %vm622_vm9, %v1059_v50 }
 0x47d   : > { %2391 = vrot.lane.b32.xlu1 %v2671_v49, %s3144_s28 }
 0x47e   : > { %v1060_v52 = vpop.trf.xlu0 }
 0x47f   : > { %2779 = vmatmul.mubr.msk.f32.gmra.mrb[8].mxu1 %vm622_vm9, %v1060_v52 }
 0x480   : > { %2885 = vmatpush3.bf16.xpose.msk.msra.mxu1 %vm3530_vm0, %v2883_v51 }
 0x481   : > { %2886 = vmatprep.subr.bf16.mxu1 %v3158_v30 }
 0x482   : > { %v1061_v55 = vpop.trf.xlu0 }
 0x483   : > { %2781 = vmatprep.mubr.msk.f32.mxu1 %vm622_vm9, %v1061_v55 }
 0x486   : > { %v1062_v57 = vpop.trf.xlu0 }
 0x487   : > { %2782 = vmatmul.mubr.msk.f32.gmra.mrb[10].mxu1 %vm622_vm9, %v1062_v57 }
 0x488   : > { %2889 = vmatpush3.bf16.xpose.msk.msra.mxu1 %vm3530_vm0, %v2887_v56  ;;  %2805 = vmatprep.mubr.msk.f32.mxu1 %vm3145_vm3, %v3143_v19 }
 0x489   : > { %2842 = vmatprep.subr.mxu1 %v3143_v19 }
 0x48f   : > { %2806 = vmatmul.mubr.msk.f32.vlgmr.msra.gmra.mrb[12].mxu1 %vm1216_vm15, %v3431_v58 }
 0x490   : > { %2844 = vmatprep.mubr.msk.f32.mxu1 %vm3145_vm3, %v3143_v19 }
 0x4a1   : > { %v1820_v59 = vpop.permute.xlu0 %1819 }
 0x4a5   : > { %v2000_v4 = vpop.permute.xlu0 %1999 }
 0x4a6   : > { %2843 = vmatpush3.msra.mxu1 %v2000_v4  ;;  %v2672_v4 = vmul.f32 -1.442695, %v3341_v23 }
 0x4a7   : > { %2845 = vmatmul.mubr.msk.f32.vlgmr.msra.gmra.mrb[14].mxu1 %vm622_vm9, %v3478_v60  ;;  %2852 = vmatprep.subr.mxu1 %v3143_v19 }
 0x4a8   : > { %2854 = vmatprep.mubr.msk.f32.mxu1 %vm3145_vm3, %v3143_v19  ;;  %3038 = vpow2.f32 %v2672_v4 }
 0x4a9   : > { %v2090_v17 = vpop.permute.xlu0 %2089 }
 0x4bf   : > { %v1414_v9 = vpop.trf.xlu1 }
 0x4c0   : > { %2810 = vmatprep.mubr.msk.f32.mxu0 %vm622_vm9, %v1414_v9 }
 0x4c3   : > { %v1415_v58 = vpop.trf.xlu1 }
 0x4c4   : > { %2811 = vmatmul.mubr.msk.f32.vlgmr.msra.gmra.mrb[12].mxu0 %vm622_vm9, %v1415_v58 }
 0x4c5   : > { %2823 = vmatpush3.msra.mxu0 %v1640_v5 }
 0x4c6   : > { %2827 = vmatprep.subr.mxu0 %v3143_v19 }
 0x4c7   : > { %v1416_v10 = vpop.trf.xlu1 }
 0x4c8   : > { %2813 = vmatprep.mubr.msk.f32.mxu0 %vm622_vm9, %v1416_v10 }
 0x4cb   : > { %v1417_v60 = vpop.trf.xlu1 }
 0x4cc   : > { %2814 = vmatmul.mubr.msk.f32.gmra.mrb[14].mxu0 %vm622_vm9, %v1417_v60 }
 0x4cf   : > { %v1418_v11 = vpop.trf.xlu1 }
 0x4d0   : > { %2816 = vmatprep.mubr.msk.f32.mxu0 %vm622_vm9, %v1418_v11 }
 0x4d3   : > { %v1419_v14 = vpop.trf.xlu1 }
 0x4d4   : > { %2817 = vmatmul.mubr.msk.f32.gmra.mrb[16].mxu0 %vm622_vm9, %v1419_v14 }
 0x4d7   : > { %v1420_v15 = vpop.trf.xlu1 }
 0x4d8   : > { %2819 = vmatprep.mubr.msk.f32.mxu0 %vm622_vm9, %v1420_v15 }
 0x4db   : > { %v1421_v16 = vpop.trf.xlu1 }
 0x4dc   : > { %2820 = vmatmul.mubr.msk.f32.gmra.mrb[18].mxu0 %vm622_vm9, %v1421_v16 }
 0x4dd   : > { %2824 = vmatprep.mubr.msk.f32.mxu0 %vm3145_vm3, %v3143_v19 }
 0x4e0   : > { %2825 = vmatmul.mubr.msk.f32.vlgmr.msra.gmra.mrb[20].mxu0 %vm622_vm9, %v3510_v35 }
 0x4e1   : > { %2828 = vmatpush3.msra.mxu0 %v1730_v6  ;;  %2829 = vmatprep.mubr.msk.f32.mxu0 %vm3145_vm3, %v3143_v19 }
 0x4e2   : > { %2832 = vmatprep.subr.mxu0 %v3143_v19 }
 0x4e4   : > { %2830 = vmatmul.mubr.msk.f32.vlgmr.msra.gmra.mrb[22].mxu0 %vm622_vm9, %v3480_v61  ;;  %v2270_v61 = vpop.permute.xlu0 %2269 }
 0x4e5   : > { %2833 = vmatpush3.msra.mxu0 %v1820_v59  ;;  %2834 = vmatprep.mubr.msk.f32.mxu0 %vm3145_vm3, %v3143_v19 }
 0x4e6   : > { %2837 = vmatprep.subr.mxu0 %v3143_v19 }
 0x4e8   : > { %2835 = vmatmul.mubr.msk.f32.vlgmr.msra.gmra.mrb[24].mxu0 %vm622_vm9, %v3482_v62 }
 0x4e9   : > { %2838 = vmatpush3.msra.mxu0 %v1910_v7  ;;  %2839 = vmatprep.mubr.msk.f32.mxu0 %vm3145_vm3, %v3143_v19 }
 0x4ea   : > { %2847 = vmatprep.subr.mxu0 %v3143_v19 }
 0x4eb   : > { %v2180_v20 = vpop.permute.xlu1 %2179 }
 0x4ec   : > { %2840 = vmatmul.mubr.msk.f32.vlgmr.msra.gmra.mrb[26].mxu0 %vm622_vm9, %v3484_v63  ;;  %2853 = vmatpush3.msra.mxu1 %v2180_v20 }
 0x4ed   : > { %2848 = vmatpush3.msra.mxu0 %v2090_v17  ;;  %2855 = vmatmul.mubr.msk.f32.vlgmr.msra.gmra.mrb[16].mxu1 %vm622_vm9, %v3502_v13 }
 0x4ee   : > { %2849 = vmatprep.mubr.msk.f32.mxu0 %vm3145_vm3, %v3143_v19  ;;  %2857 = vmatprep.subr.mxu0 %v3143_v19 }
 0x4ef   : > { %2862 = vmatprep.subr.bf16.mxu1 %v3143_v19  ;;  %2870 = vmatprep.mubr.msk.bf16.mxu1 %vm3145_vm3, %v3143_v19  ;;  %v2392_v43 = vpop.permute.xlu1 %2391 }
 0x4f0   : > { %2850 = vmatmul.mubr.msk.f32.vlgmr.msra.gmra.mrb[28].mxu0 %vm622_vm9, %v3486_v1  ;;  %v2394_v52 = vmul.f32 %v2392_v43, %v3436_v0  ;;  %v3039_v0 = vpop.eup %3038 }
 0x4f1   : > { %2858 = vmatpush3.msra.mxu0 %v2270_v61  ;;  %2859 = vmatprep.mubr.msk.f32.mxu0 %vm3145_vm3, %v3143_v19  ;;  %v2403_v6 = vadd.f32 1.0, %v3039_v0  ;;  %vm2378_vm3 = vcmask 326656  }
 0x4f3   : > { %3040 = vrcp.f32 %v2403_v6 }
 0x4f4   : > { %2860 = vmatmul.mubr.msk.f32.vlgmr.msra.gmra.mrb[30].mxu0 %vm622_vm9, %v3506_v33 }
 0x542   : > { %v2774_v62 = vpop.f32.mrb[4].mxu1 }
 0x543   : > { %v1164_v63 = vpop.f32.mrb[5].mxu1 }
 0x54a   : > { %v2777_v22 = vpop.f32.mrb[6].mxu1 }
 0x54b   : > { %v1174_v24 = vpop.f32.mrb[7].mxu1 }
 0x552   : > { %v2780_v25 = vpop.f32.mrb[8].mxu1 }
 0x553   : > { %v1184_v18 = vpop.f32.mrb[9].mxu1 }
 0x55a   : > { %v3627_v28 = vpop.f32.mrb[10].mxu1 }
 0x55b   : > { %v1194_v12 = vpop.f32.mrb[11].mxu1 }
 0x562   : > { %v1389_v29 = vpop.f32.mrb[12].mxu1 }
 0x563   : > { %v3630_v26 = vmul.f32 %v1389_v29, %v3456_v21  ;;  %v2807_v1 = vpop.f32.mrb[13].mxu1 }
 0x57a   : > { %v2071_v30 = vpop.f32.mrb[14].mxu1 }
 0x57b   : > { %2358 = vrot.lane.b32.xlu1 %v2071_v30, %s3142_s18  ;;  %v2846_v31 = vpop.f32.mrb[15].mxu1  ;;  %s2681_s18 = sshll.u32 %s3126_s17, 1  ;;  %s3807_s17 = sand.u32 1, %s3114_s14  }
 0x597   : > { %v3633_v13 = vpop.f32.mrb[12].mxu0 }
 0x598   : > { %v3635_v8 = vpop.f32.mrb[13].mxu0 }
 0x59f   : > { %v3637_v32 = vpop.f32.mrb[14].mxu0 }
 0x5a0   : > { %v3639_v33 = vpop.f32.mrb[15].mxu0 }
 0x5a7   : > { %v3641_v34 = vpop.f32.mrb[16].mxu0 }
 0x5a8   : > { %v3643_v42 = vpop.f32.mrb[17].mxu0 }
 0x5af   : > { %v3645_v35 = vpop.f32.mrb[18].mxu0 }
 0x5b0   : > { %v3647_v21 = vpop.f32.mrb[19].mxu0 }
 0x5b3   : > { %v1711_v36 = vpop.f32.mrb[20].mxu0 }
 0x5b4   : > { %v2826_v38 = vpop.f32.mrb[21].mxu0 }
 0x5b7   : > { %v1801_v39 = vpop.f32.mrb[22].mxu0 }
 0x5b8   : > { %2346 = vrot.lane.b32.xlu0 %v1801_v39, %s3161_s19  ;;  %v2831_v40 = vpop.f32.mrb[23].mxu0 }
 0x5bb   : > { %v1891_v41 = vpop.f32.mrb[24].mxu0 }
 0x5bc   : > { %v2836_v46 = vpop.f32.mrb[25].mxu0  ;;  %2350 = vrot.lane.b32.xlu1 %v1891_v41, %s3162_s12 }
 0x5bf   : > { %v1981_v47 = vpop.f32.mrb[26].mxu0 }
 0x5c0   : > { %2354 = vrot.lane.b32.xlu0 %v1981_v47, %s3160_s25  ;;  %v2841_v49 = vpop.f32.mrb[27].mxu0  ;;  %v2251_v50 = vpop.f32.mrb[16].mxu1  ;;  %s3805_s25 = scalar_lea.vmem [#allocation4], %s3294_s21 }
 0x5c1   : > { %2366 = vrot.lane.b32.xlu1 %v2251_v50, %s3159_s24  ;;  %v2856_v51 = vpop.f32.mrb[17].mxu1  ;;  %s2525_s19 = sshll.u32 %s3805_s25, 4  ;;  %s3721_s19 = int_to_ptr.vmem [resolvable:$true] %s2525_s19 }
 0x5c3   : > { %v2161_v55 = vpop.f32.mrb[28].mxu0 }
 0x5c4   : > { %2362 = vrot.lane.b32.xlu0 %v2161_v55, %s3156_s23  ;;  %v2851_v56 = vpop.f32.mrb[29].mxu0 }
 0x5c5   : > { %2396 = vrot.lane.b32.xlu1 %v2394_v52, %s3144_s28  ;;  %s2521_s28 = sadd.s32 %s3122_s16, %s2681_s18  ;;  %s3806_s16 = smov %s3805_s25 }
 0x5c6   : > { %s2682_s24 = sshll.u32 %s2521_s28, 7  ;;  %s2510_s18 = scalar_lea.sflag [#allocation5], %s3807_s17 }
 0x5c7   : > { %v2341_v57 = vpop.f32.mrb[30].mxu0  ;;  %s3719_s29 = scalar_lea.hbm %s3787_s10, %s2682_s24  ;;  %s3044_s28 = scalar_lea.vmem %s3721_s19, 128 }
 0x5c8   : > { %2370 = vrot.lane.b32.xlu0 %v2341_v57, %s3155_s22  ;;  %v2861_v59 = vpop.f32.mrb[31].mxu0  ;;  %p3045_p1 = scmp.ne.s32.totalorder %s3721_s19, %s3044_s28  ;;  %s3163_s22 = smov [#allocation4]  }
 0x5c9   : > { %1561 = vperm.xlu1 %2992, %v1164_v63   ;;  %s3048_s23 = sshll.u32 %s3163_s22, 4  ;;  %s3049_s23 = int_to_ptr.vmem [resolvable:$false] %s3048_s23 }
 0x5ca   : > { %p3046_p2 = pnand %p3045_p1, %p3270_p3  ;;  %s3050_s24 = scalar_lea.vmem %s3049_s23, 256 }
 0x5cb   : > { %p3051_p5 = scmp.lt.s32.totalorder %s3721_s19, %s3049_s23  ;;  %p3052_p6 = scmp.lt.s32.totalorder %s3050_s24, %s3044_s28 }
 0x5cc   : > { %p3047_p4 = pneg %p3046_p2 }
 0x5cd   : > { %1566 = vperm.xlu1 %2992, %v2774_v62   ;;  %v3041_v62 = vpop.eup %3040  ;;  %p3053_p7 = por %p3052_p6, %p3051_p5 }
 0x5cf   : > { %p3054_p9 = pnand %p3053_p7, %p3047_p4 }
 0x5d1   : > { %1571 = vperm.xlu1 %2992, %v1174_v24  }
 0x5d5   : > { %1576 = vperm.xlu1 %2992, %v2777_v22  }
 0x5d9   : > { %1581 = vperm.xlu1 %2992, %v1184_v18   ;;  %v2406_v18 = vmul.f32 %v3041_v62, %v3341_v23 }
 0x5dd   : > { %1586 = vperm.xlu1 %2992, %v2780_v25  }
 0x5e1   : > { %1591 = vperm.xlu1 %2992, %v1194_v12  }
 0x5ed   : > { %v2359_v5 = vpop.permute.xlu1 %2358 }
 0x62a   : > { %v2347_v7 = vpop.permute.xlu0 %2346 }
 0x62b   : > { %v2373_v58 = vsel %vm622_vm9, %v1711_v36, %v2347_v7 }
 0x62e   : > { %v2351_v9 = vpop.permute.xlu1 %2350 }
 0x62f   : > { %v2374_v10 = vsel %vm1216_vm15, %v2373_v58, %v2351_v9 }
 0x632   : > { %v2355_v60 = vpop.permute.xlu0 %2354 }
 0x633   : > { %v2376_v11 = vsel %vm2375_vm1, %v2374_v10, %v2355_v60  ;;  %v2367_v16 = vpop.permute.xlu1 %2366 }
 0x634   : > { %v2377_v14 = vsel %vm437_vm2, %v2376_v11, %v2359_v5 }
 0x636   : > { %v2363_v15 = vpop.permute.xlu0 %2362 }
 0x637   : > { %v2379_v17 = vsel %vm2378_vm3, %v2377_v14, %v2363_v15  ;;  %v2397_v24 = vpop.permute.xlu1 %2396 }
 0x638   : > { %v2381_v20 = vsel %vm2380_vm4, %v2379_v17, %v2367_v16 }
 0x63a   : > { %v2371_v61 = vpop.permute.xlu0 %2370 }
 0x63b   : > { %v2383_v63 = vsel %vm2382_vm5, %v2381_v20, %v2371_v61 }
 0x63c   : > { %v2384_v22 = vadd.f32 %v2383_v63, %v3630_v26 }
 0x63e   : > { %v2399_v25 = vadd.f32 %v2397_v24, %v2384_v22 }
 0x640   : > { %v2407_v12 = vmul.f32 %v2406_v18, %v2399_v25 }
 0x642   : > { %v2408_v29 = vmul.f32 %v2407_v12, %v2407_v12 }
 0x644   : > { %v2409_v1 = vsel %vm489_vm10, %v2408_v29, 0.0 }
 0x645   : > { %2410 = vadd.xlane.f32.xlu0 %v2409_v1 }
 0x648   : > { %v1562_v30 = vpop.permute.xlu1 %1561 }
 0x649   : > { %v1599_v31 = vmul.f32 %v1562_v30, %v3521_v53 }
 0x64b   : > { %v1607_v36 = vadd.f32 %v1599_v31, %v3635_v8 }
 0x64c   : > { %v1567_v38 = vpop.permute.xlu1 %1566 }
 0x64d   : > { %1615 = vst.msk [vmem:[#allocation3] sm:$0xff] %vm1216_vm15, %v1607_v36  ;;  %v1600_v39 = vmul.f32 %v1567_v38, %v3523_v37 }
 0x64f   : > { %v1608_v26 = vadd.f32 %v3633_v13, %v1600_v39 }
 0x650   : > { %v1572_v40 = vpop.permute.xlu1 %1571 }
 0x651   : > { %1616 = vst.msk [vmem:[#allocation3 + $0x8] sm:$0xff] %vm1216_vm15, %v1608_v26  ;;  %v1601_v23 = vmul.f32 %v1572_v40, %v3537_v3  ;;  %v3000_v3 = vld [vmem:[%s3785_s8] sm:$0xff]  }
 0x652   : > { %2863 = vmatpush3.bf16.msra.mxu1 %v3000_v3 }
 0x653   : > { %v1609_v41 = vadd.f32 %v1601_v23, %v3639_v33  ;;  %2864 = vmatprep.subr.bf16.mxu1 %v3143_v19 }
 0x654   : > { %v1577_v46 = vpop.permute.xlu1 %1576 }
 0x655   : > { %1617 = vst.msk [vmem:[#allocation3 + $0x10] sm:$0xff] %vm1216_vm15, %v1609_v41  ;;  %v1602_v53 = vmul.f32 %v1577_v46, %v3539_v45 }
 0x657   : > { %v1610_v8 = vadd.f32 %v3637_v32, %v1602_v53 }
 0x658   : > { %v1582_v43 = vpop.permute.xlu1 %1581 }
 0x659   : > { %1618 = vst.msk [vmem:[#allocation3 + $0x18] sm:$0xff] %vm1216_vm15, %v1610_v8  ;;  %v1603_v37 = vmul.f32 %v1582_v43, %v3549_v44  ;;  %v3001_v44 = vld [vmem:[%s3785_s8 + $0x8] sm:$0xff]  }
 0x65a   : > { %2865 = vmatpush3.bf16.msra.mxu1 %v3001_v44 }
 0x65b   : > { %v1611_v13 = vadd.f32 %v1603_v37, %v3643_v42  ;;  %1596 = vperm.xlu0 %2991, %v3627_v28   ;;  %2866 = vmatprep.subr.bf16.mxu1 %v3143_v19 }
 0x65c   : > { %v1587_v33 = vpop.permute.xlu1 %1586 }
 0x65d   : > { %1619 = vst.msk [vmem:[#allocation3 + $0x20] sm:$0xff] %vm1216_vm15, %v1611_v13  ;;  %v1604_v45 = vmul.f32 %v1587_v33, %v3551_v48  ;;  %v3002_v48 = vld [vmem:[%s3785_s8 + $0x10] sm:$0xff]  }
 0x65e   : > { %2867 = vmatpush3.bf16.msra.mxu1 %v3002_v48 }
 0x65f   : > { %v1612_v32 = vadd.f32 %v3641_v34, %v1604_v45  ;;  %2993 = vset.pattern.permute.xlu0 %v3157_v27  ;;  %v3003_v27 = vld [vmem:[%s3785_s8 + $0x18] sm:$0xff]   ;;  %2868 = vmatprep.subr.bf16.mxu1 %v3143_v19  ;;  %v2673_v19 = vld [vmem:[%s3784_s7] ss:$0 sm:$0xff] }
 0x660   : > { %v1592_v28 = vpop.permute.xlu1 %1591 }
 0x661   : > { %1620 = vst.msk [vmem:[#allocation3 + $0x28] sm:$0xff] %vm1216_vm15, %v1612_v32  ;;  %v1605_v42 = vmul.f32 %v1592_v28, %v3563_v2 }
 0x662   : > { %2869 = vmatpush3.bf16.msra.mxu1 %v3003_v27 }
 0x663   : > { %v1613_v34 = vadd.f32 %v1605_v42, %v3647_v21 }
 0x665   : > { %1621 = vst.msk [vmem:[#allocation3 + $0x30] sm:$0xff] %vm1216_vm15, %v1613_v34 }
 0x6d2   : > { %v2411_v2 = vpop.xlane.xlu0 %2410 }
 0x6d3   : > { %v2413_v47 = vmul.f32 0.015625, %v2411_v2 }
 0x6d5   : > { %v2414_v49 = vadd.f32 1e-05, %v2413_v47 }
 0x6d7   : > { %3042 = vrsqrt.f32 %v2414_v49 }
 0x6da   : > { %v1597_v50 = vpop.permute.xlu0 %1596 }
 0x6db   : > { %v1606_v21 = vmul.f32 %v1597_v50, %v3565_v54  ;;  %v2674_v54 = vld [vmem:[%s3786_s9] ss:$0 sm:$0xff] }
 0x6dd   : > { %v1614_v51 = vadd.f32 %v3645_v35, %v1606_v21 }
 0x6df   : > { %1622 = vst.msk [vmem:[#allocation3 + $0x38] sm:$0xff] %vm1216_vm15, %v1614_v51 }
 0x6e1   : > { %v3043_v52 = vpop.eup %3042 }
 0x6e2   : > { %v2416_v55 = vmul.f32 %v3043_v52, %v2407_v12 }
 0x6e4   : > { %v2424_v56 = vmul.f32 %v2673_v19, %v2416_v55 }
 0x6e6   : > { %v2425_v57 = vpack.c.bf16 %v2424_v56, %v2424_v56 }
 0x6e8   : > { %2871 = vmatmul.mubr.msk.bf16.vlgmr.msra.gmra.mrb[20].mxu1 %vm489_vm10, %v2425_v57 }
 0x7bb   : > { %v2502_v35 = vpop.f32.mrb[20].mxu1 }
 0x7bc   : > { %v2503_v59 = vadd.f32 %v2674_v54, %v2502_v35  ;;  %v2872_v4 = vpop.f32.mrb[21].mxu1 }
 0x7bd   : > { %v2505_v0 = vpop.f32.mrb[22].mxu1 }
 0x7be   : > { %2508 = vst.msk [vmem:[%s3806_s16] sm:$0xff] %vm437_vm2, %v2503_v59  ;;  %v2873_v5 = vpop.f32.mrb[23].mxu1 }
 0x7bf   : > { %3057 = shalt.err (!%p3054_p9)
}
 0x7c0   : > { %s3058_s21 = scalar_lea.hbm %s3719_s29, 128  ;;  %s3062_s30 = scalar_lea.hbm %s3787_s10, 512 }
 0x7c1   : > { %p3059_p10 = scmp.ne.s32.totalorder %s3719_s29, %s3058_s21  ;;  %p3063_p13 = scmp.lt.u32.totalorder %s3719_s29, %s3787_s10 }
 0x7c2   : > { %p3064_p0 = scmp.lt.u32.totalorder %s3062_s30, %s3058_s21  ;;  %p3066_p2 = scmp.lt.u32.totalorder %s3058_s21, %s3719_s29 }
 0x7c3   : > { %p3060_p11 = pnand %p3059_p10, %p3270_p3 }
 0x7c4   : > { %p3065_p1 = por %p3064_p0, %p3063_p13 }
 0x7c5   : > { %p3061_p12 = pneg %p3060_p11 }
 0x7c6   : > { %p3067_p4 = por %p3066_p2, %p3065_p1 }
 0x7c8   : > { %p3068_p5 = pnand %p3067_p4, %p3061_p12 }
 0x7ca   : > { %3071 = shalt.err (!%p3068_p5)
}
 0x7cb   : > { %2890 = dma.vmem_to_hbm [thread:$0]  (%p3270_p3), %s3721_s19, 128, %s3719_s29, %s2510_s18  }
 0x7cc PF: > { %p2896_p6 = scmp.ge.s32.totalorder %s3138_s20, 2  ;;  %s2537_s28 = sand.u32 1, %s3110_s13  }
 0x7cd   : > { %s2538_s22 = scalar_lea.sflag [#allocation5], %s2537_s28 }
 0x7ce   : > { %p2893_p7 = pnand %p2896_p6, %p3279_p8 }
 0x7d0   : > { %3105 = dma.done.wait (!%p2893_p7), %s2538_s22, 128  }
 0x7d1   : > { %3107 = vsyncadd (!%p2893_p7), %s2538_s22, 4294967168  ;;  %s23_s20 = sadd.s32 1, %s3138_s20   ;;  %s3808_s16 = sld [smem:[#allocation7_spill]] }
 0x7d2   : > { %p20_p9 = scmp.ge.s32.totalorder %s23_s20, 6   ;;  %s3809_s17 = sld [smem:[#allocation8_spill]] }
 0x7d3   : > { %s3810_s18 = sld [smem:[#allocation9_spill]]  ;;  %s3811_s19 = sld [smem:[#allocation10_spill]] }
 0x7d4   : > { %s3812_s13 = smov %s3114_s14  ;;  %s3813_s14 = smov %s3118_s15 }
 0x7d5   : > { %s3814_s15 = smov %s3288_s11  ;;  %22 = sbr.rel (!%p20_p9) target bundleno = 5 (0x5), region = 99 }
 0x7dc   :  { %2543 = vsyncpa [#allocation5], 1 }
 0x7dd   :  { %2545 = vsyncpa [#allocation5 + $0x1], 1 }

</bundles_post_ra>
